<compile_context>
chip_gen: v7x
topology: tpu7x:2x2x1
jax: 0.10.0
libtpu: 0.0.40
codegen_flags: <defaults>
</compile_context>

<pallas_src>
import functools

import jax
import jax.numpy as jnp
from jax.experimental import pallas as pl
from jax.experimental.pallas import tpu as pltpu


INPUT_DIM = 4
HIDDEN_DIM = 50
OUTPUT_DIM = 1


def _pinn_kernel(scal_ref,               # SMEM (3,)  [0.5/k_u, T0, T_max]
                 x_ref,                  # VMEM (4, tm)        batch on lanes
                 w_in_ref, b_in_ref,     # VMEM (H, 4), (H, 1) (norm/scale folded in)
                 w_h1_ref, b_h1_ref,     # VMEM (H, H), (H, 1)
                 w_r1_ref, b_r1_ref,     # VMEM (H, H), (H, 1) (AdaptiveTanh `a` folded in)
                 w_r2_ref, b_r2_ref,     # VMEM (H, H), (H, 1)
                 w_out_ref, b_out_ref,   # VMEM (1, H), (1, 1)
                 out_ref):               # VMEM (1, tm)        lane-dense output
    c_out = scal_ref[0]          # 0.5 / k_u
    t_amb = scal_ref[1]          # T0
    t_max = scal_ref[2]          # T_max_allowed

    x = x_ref[...]                                                     # (4, tm)

    # h = tanh(input_layer(x_scaled))   (normalization folded into W_in/b_in)
    h = jnp.tanh(
        jnp.dot(w_in_ref[...], x, preferred_element_type=jnp.float32)
        + b_in_ref[...])                                               # (H, tm)

    # h = tanh(hidden1(h))
    h = jnp.tanh(
        jnp.dot(w_h1_ref[...], h, preferred_element_type=jnp.float32)
        + b_h1_ref[...])

    # Residual block: layer2(AdaptiveTanh(layer1(h))) + h
    # `a` is pre-folded into W_r1/b_r1 on the host, so this is a plain tanh.
    r = jnp.tanh(
        jnp.dot(w_r1_ref[...], h, preferred_element_type=jnp.float32)
        + b_r1_ref[...])
    r = jnp.dot(w_r2_ref[...], r, preferred_element_type=jnp.float32) + b_r2_ref[...]

    # h = tanh(res_block(h))
    h = jnp.tanh(r + h)

    # u = output_layer(h); T = clamp(T0 + (0.5/k_u) * softplus(u), T0, T_max)
    u = (jnp.dot(w_out_ref[...], h, preferred_element_type=jnp.float32)
         + b_out_ref[...])                                             # (1, tm)
    u_sp = jnp.maximum(u, 0.0) + jnp.log1p(jnp.exp(-jnp.abs(u)))       # stable softplus
    out_ref[...] = jnp.clip(t_amb + c_out * u_sp, t_amb, t_max)


def _pick_tile_m(n):
    """Multiple of 128; ~2 grid steps (feeds both v7x TCs, ~free on v5e/v6e)."""
    n128 = ((n + 127) // 128) * 128
    if n128 <= 128:
        return 128
    tm = ((n128 // 2 + 127) // 128) * 128
    return min(tm, 4096)    # VMEM-safe on v7x (64 MiB physical, 32 MiB scoped)


@functools.partial(jax.jit, static_argnames=("tile_m",))
def _pinn_forward_impl(x, params, tile_m):
    n, d = x.shape
    h = HIDDEN_DIM

    # ---- host-side folding of normalization / scaling into the input layer ----
    # x_scaled = (x - mean)/std * [k_x,k_x,k_x,k_t]
    #   => W_in' = W_in * (scale/std)[col],  b_in' = b_in - W_in @ (mean*scale/std)
    scale = jnp.concatenate([jnp.full((3,), params["k_x"], jnp.float32),
                             jnp.full((1,), params["k_t"], jnp.float32)])
    s = scale / params["input_std"]                       # (4,)
    m = params["input_mean"] * s                          # (4,)
    w_in = params["W_in"] * s[None, :]                    # (H, 4)
    b_in = (params["b_in"] - params["W_in"] @ m).reshape(h, 1)

    w_h1 = params["W_h1"]
    b_h1 = params["b_h1"].reshape(h, 1)
    # AdaptiveTanh gain `a` folded into the first residual layer.
    a = jnp.asarray(params["a"], jnp.float32)
    w_r1 = a * params["W_r1"]
    b_r1 = (a * params["b_r1"]).reshape(h, 1)
    w_r2 = params["W_r2"]
    b_r2 = params["b_r2"].reshape(h, 1)
    w_out = params["W_out"]                               # (1, H)
    b_out = params["b_out"].reshape(OUTPUT_DIM, 1)

    scalars = jnp.stack([
        0.5 / jnp.asarray(params["k_u"], jnp.float32),
        jnp.asarray(params["T0"], jnp.float32),
        jnp.asarray(params["T_max_allowed"], jnp.float32),
    ]).astype(jnp.float32)

    # ---- transposed, lane-dense layout: batch on lanes, minimal tile padding ----
    n_pad = ((n + tile_m - 1) // tile_m) * tile_m
    x_t = jnp.pad(x.T, ((0, 0), (0, n_pad - n)))          # fused by XLA inside this jit

    grid = (n_pad // tile_m,)
    fixed = lambda i: (0, 0)   # resident (constant block index) operands

    in_specs = [
        pl.BlockSpec(memory_space=pltpu.MemorySpace.SMEM),         # scalars
        pl.BlockSpec((d, tile_m), lambda i: (0, i)),               # x (4, tm)
        pl.BlockSpec((h, d), fixed),                               # W_in
        pl.BlockSpec((h, 1), fixed),                               # b_in
        pl.BlockSpec((h, h), fixed),                               # W_h1
        pl.BlockSpec((h, 1), fixed),                               # b_h1
        pl.BlockSpec((h, h), fixed),                               # W_r1
        pl.BlockSpec((h, 1), fixed),                               # b_r1
        pl.BlockSpec((h, h), fixed),                               # W_r2
        pl.BlockSpec((h, 1), fixed),                               # b_r2
        pl.BlockSpec((OUTPUT_DIM, h), fixed),                      # W_out
        pl.BlockSpec((OUTPUT_DIM, 1), fixed),                      # b_out
    ]
    out_specs = pl.BlockSpec((OUTPUT_DIM, tile_m), lambda i: (0, i))

    # Advisory cost hint for XLA scheduling around the custom call.
    flops = 2 * (d * h + 3 * h * h + h * OUTPUT_DIM) * n_pad
    transcendentals = (3 * h + 2) * n_pad                 # 3 tanh layers + softplus
    bytes_accessed = 4 * ((d + OUTPUT_DIM) * n_pad + 3 * h * h + h * d + 4 * h + 2)
    cost = pl.CostEstimate(flops=flops,
                           transcendentals=transcendentals,
                           bytes_accessed=bytes_accessed)

    out_t = pl.pallas_call(
        _pinn_kernel,
        out_shape=jax.ShapeDtypeStruct((OUTPUT_DIM, n_pad), jnp.float32),
        grid_spec=pltpu.PrefetchScalarGridSpec(
            num_scalar_prefetch=0,
            grid=grid,
            in_specs=in_specs,
            out_specs=out_specs,
        ),
        compiler_params=pltpu.CompilerParams(
            dimension_semantics=("parallel",)),
        cost_estimate=cost,
    )(scalars, x_t,
      w_in, b_in, w_h1, b_h1, w_r1, b_r1, w_r2, b_r2, w_out, b_out)

    return out_t[:, :n].T                                 # (N, 1)


def pinn_lmd_forward(x, params, *, tile_m=None):
    """Fused PINN_LMD forward pass.  x: f32[N, 4] -> f32[N, 1]."""
    n, d = x.shape
    assert d == INPUT_DIM
    if tile_m is None:
        tile_m = _pick_tile_m(n)
    assert tile_m % 128 == 0, "tile_m must be a multiple of 128 (lane width)"
    return _pinn_forward_impl(x, params, tile_m)


def _xavier_normal(key, out_dim, in_dim, gain=1.0):
    # torch.nn.init.xavier_normal_ on a [out, in] weight (kept in [out, in]).
    std = gain * (2.0 / (in_dim + out_dim)) ** 0.5
    return std * jax.random.normal(key, (out_dim, in_dim), dtype=jnp.float32)


def init_params(key):
    """Deterministic parameter init mirroring PINN_LMD.__init__."""
    h, d, o = HIDDEN_DIM, INPUT_DIM, OUTPUT_DIM
    keys = jax.random.split(key, 5)
    return {
        # buffers
        "input_mean": jnp.zeros((d,), jnp.float32),
        "input_std": jnp.ones((d,), jnp.float32),
        "k_x": 1.0, "k_t": 1.0, "k_u": 1.0,
        # AdaptiveTanh parameter (n=10)
        "a": 10.0,
        # physics constants (self.params['T0'] and clamp max)
        "T0": 300.0,
        "T_max_allowed": 3500.0,
        # Linear layers: PyTorch [out, in] weights, (out,) biases (zero init)
        "W_in": _xavier_normal(keys[0], h, d),
        "b_in": jnp.zeros((h,), jnp.float32),
        "W_h1": _xavier_normal(keys[1], h, h),
        "b_h1": jnp.zeros((h,), jnp.float32),
        "W_r1": _xavier_normal(keys[2], h, h),
        "b_r1": jnp.zeros((h,), jnp.float32),
        "W_r2": _xavier_normal(keys[3], h, h),
        "b_r2": jnp.zeros((h,), jnp.float32),
        "W_out": _xavier_normal(keys[4], o, h, gain=0.1),
        "b_out": jnp.zeros((o,), jnp.float32),
    }


def _reference_forward(x, p):
    """Pure-JAX reference mirroring the PyTorch forward exactly (unfolded)."""
    xn = (x - p["input_mean"]) / p["input_std"]
    scale = jnp.concatenate(
        [jnp.full((3,), p["k_x"]), jnp.full((1,), p["k_t"])]).astype(jnp.float32)
    xs = xn * scale
    h = jnp.tanh(xs @ p["W_in"].T + p["b_in"])
    h = jnp.tanh(h @ p["W_h1"].T + p["b_h1"])
    r = jnp.tanh(p["a"] * (h @ p["W_r1"].T + p["b_r1"]))
    r = r @ p["W_r2"].T + p["b_r2"]
    h = jnp.tanh(r + h)
    u = 0.5 * jax.nn.softplus(h @ p["W_out"].T + p["b_out"])
    t = p["T0"] + u / p["k_u"]
    return jnp.clip(t, p["T0"], p["T_max_allowed"])


if __name__ == "__main__":
    key = jax.random.PRNGKey(0)
    pkey, xkey, mkey, skey = jax.random.split(key, 4)
    params = init_params(pkey)

    # Non-trivial buffers / scaling factors so the host-side folding is exercised
    # (mirrors set_input_stats / set_scaling_factors being called).
    params["input_mean"] = 0.3 * jax.random.normal(mkey, (INPUT_DIM,), jnp.float32)
    params["input_std"] = 1.0 + 0.5 * jax.random.uniform(skey, (INPUT_DIM,), jnp.float32)
    params["k_x"] = 0.5
    params["k_t"] = 0.2
    params["k_u"] = 1.0 / 1000.0

    # Collocation-point batch: [N, 4] = (x, y, z, t) coordinates.
    # Deliberately not a multiple of 128 to exercise ragged-lane padding.
    # Auto-picked tile_m=512 -> 2 "parallel" grid steps (feeds both v7x TCs,
    # ~free overhead on single-TC v5e/v6e).
    N = 1000
    x = jax.random.normal(xkey, (N, INPUT_DIM), dtype=jnp.float32)

    out = pinn_lmd_forward(x, params)
    out = jax.block_until_ready(out)

    ref = _reference_forward(x, params)
    assert out.shape == (N, OUTPUT_DIM)
    max_err = float(jnp.max(jnp.abs(out - ref)))
    assert jnp.allclose(out, ref, rtol=1e-4, atol=1e-3), max_err

    print("KERNEL_OK")
</pallas_src>

<mosaic_0001>
module attributes {stable_mosaic.version = 11 : i64} {
  func.func @_pinn_kernel(%arg0: i32, %arg1: memref<3xf32, #tpu.memory_space<smem>>, %arg2: memref<4x512xf32, #tpu.memory_space<vmem>>, %arg3: memref<50x4xf32, #tpu.memory_space<vmem>>, %arg4: memref<50x1xf32, #tpu.memory_space<vmem>>, %arg5: memref<50x50xf32, #tpu.memory_space<vmem>>, %arg6: memref<50x1xf32, #tpu.memory_space<vmem>>, %arg7: memref<50x50xf32, #tpu.memory_space<vmem>>, %arg8: memref<50x1xf32, #tpu.memory_space<vmem>>, %arg9: memref<50x50xf32, #tpu.memory_space<vmem>>, %arg10: memref<50x1xf32, #tpu.memory_space<vmem>>, %arg11: memref<1x50xf32, #tpu.memory_space<vmem>>, %arg12: memref<1x1xf32, #tpu.memory_space<vmem>>, %arg13: memref<1x512xf32, #tpu.memory_space<vmem>>) attributes {dimension_semantics = [#tpu.dimension_semantics<parallel>], iteration_bounds = array<i64: 2>, scalar_prefetch = 0 : i64, scratch_operands = 0 : i64, tpu.core_type = #tpu.core_type<tc>, window_params = [{transform_indices = @transform_0, window_bounds = array<i64: 3>}, {transform_indices = @transform_1, window_bounds = array<i64: 4, 512>}, {pipeline_mode = #tpu.pipeline_mode<synchronous>, transform_indices = @transform_2, window_bounds = array<i64: 50, 4>}, {pipeline_mode = #tpu.pipeline_mode<synchronous>, transform_indices = @transform_3, window_bounds = array<i64: 50, 1>}, {pipeline_mode = #tpu.pipeline_mode<synchronous>, transform_indices = @transform_4, window_bounds = array<i64: 50, 50>}, {pipeline_mode = #tpu.pipeline_mode<synchronous>, transform_indices = @transform_5, window_bounds = array<i64: 50, 1>}, {pipeline_mode = #tpu.pipeline_mode<synchronous>, transform_indices = @transform_6, window_bounds = array<i64: 50, 50>}, {pipeline_mode = #tpu.pipeline_mode<synchronous>, transform_indices = @transform_7, window_bounds = array<i64: 50, 1>}, {pipeline_mode = #tpu.pipeline_mode<synchronous>, transform_indices = @transform_8, window_bounds = array<i64: 50, 50>}, {pipeline_mode = #tpu.pipeline_mode<synchronous>, transform_indices = @transform_9, window_bounds = array<i64: 50, 1>}, {pipeline_mode = #tpu.pipeline_mode<synchronous>, transform_indices = @transform_10, window_bounds = array<i64: 1, 50>}, {pipeline_mode = #tpu.pipeline_mode<synchronous>, transform_indices = @transform_11, window_bounds = array<i64: 1, 1>}, {transform_indices = @transform_12, window_bounds = array<i64: 1, 512>}]} {
    %c0 = arith.constant 0 : index
    %0 = memref.load %arg1[%c0] : memref<3xf32, #tpu.memory_space<smem>>
    %c1 = arith.constant 1 : index
    %1 = memref.load %arg1[%c1] : memref<3xf32, #tpu.memory_space<smem>>
    %c2 = arith.constant 2 : index
    %2 = memref.load %arg1[%c2] : memref<3xf32, #tpu.memory_space<smem>>
    %c0_0 = arith.constant 0 : index
    %c0_1 = arith.constant 0 : index
    %3 = vector.load %arg2[%c0_0, %c0_1] : memref<4x512xf32, #tpu.memory_space<vmem>>, vector<4x512xf32>
    %c0_2 = arith.constant 0 : index
    %c0_3 = arith.constant 0 : index
    %4 = vector.load %arg3[%c0_2, %c0_3] : memref<50x4xf32, #tpu.memory_space<vmem>>, vector<50x4xf32>
    %cst = arith.constant dense<0.000000e+00> : vector<50x512xf32>
    %5 = tpu.matmul %4, %3, %cst {dimension_numbers = #tpu.dot_dimension_numbers<[1], [0], [0], [1], [0, 0, 1, 1], [], []>} : vector<50x4xf32>, vector<4x512xf32>, vector<50x512xf32> -> vector<50x512xf32>
    %c0_4 = arith.constant 0 : index
    %c0_5 = arith.constant 0 : index
    %6 = vector.load %arg4[%c0_4, %c0_5] : memref<50x1xf32, #tpu.memory_space<vmem>>, vector<50x1xf32>
    %7 = vector.broadcast %6 : vector<50x1xf32> to vector<50x512xf32>
    %8 = arith.addf %5, %7 : vector<50x512xf32>
    %9 = math.tanh %8 : vector<50x512xf32>
    %c0_6 = arith.constant 0 : index
    %c0_7 = arith.constant 0 : index
    %10 = vector.load %arg5[%c0_6, %c0_7] : memref<50x50xf32, #tpu.memory_space<vmem>>, vector<50x50xf32>
    %cst_8 = arith.constant dense<0.000000e+00> : vector<50x512xf32>
    %11 = tpu.matmul %10, %9, %cst_8 {dimension_numbers = #tpu.dot_dimension_numbers<[1], [0], [0], [1], [0, 0, 1, 1], [], []>} : vector<50x50xf32>, vector<50x512xf32>, vector<50x512xf32> -> vector<50x512xf32>
    %c0_9 = arith.constant 0 : index
    %c0_10 = arith.constant 0 : index
    %12 = vector.load %arg6[%c0_9, %c0_10] : memref<50x1xf32, #tpu.memory_space<vmem>>, vector<50x1xf32>
    %13 = vector.broadcast %12 : vector<50x1xf32> to vector<50x512xf32>
    %14 = arith.addf %11, %13 : vector<50x512xf32>
    %15 = math.tanh %14 : vector<50x512xf32>
    %c0_11 = arith.constant 0 : index
    %c0_12 = arith.constant 0 : index
    %16 = vector.load %arg7[%c0_11, %c0_12] : memref<50x50xf32, #tpu.memory_space<vmem>>, vector<50x50xf32>
    %cst_13 = arith.constant dense<0.000000e+00> : vector<50x512xf32>
    %17 = tpu.matmul %16, %15, %cst_13 {dimension_numbers = #tpu.dot_dimension_numbers<[1], [0], [0], [1], [0, 0, 1, 1], [], []>} : vector<50x50xf32>, vector<50x512xf32>, vector<50x512xf32> -> vector<50x512xf32>
    %c0_14 = arith.constant 0 : index
    %c0_15 = arith.constant 0 : index
    %18 = vector.load %arg8[%c0_14, %c0_15] : memref<50x1xf32, #tpu.memory_space<vmem>>, vector<50x1xf32>
    %19 = vector.broadcast %18 : vector<50x1xf32> to vector<50x512xf32>
    %20 = arith.addf %17, %19 : vector<50x512xf32>
    %21 = math.tanh %20 : vector<50x512xf32>
    %c0_16 = arith.constant 0 : index
    %c0_17 = arith.constant 0 : index
    %22 = vector.load %arg9[%c0_16, %c0_17] : memref<50x50xf32, #tpu.memory_space<vmem>>, vector<50x50xf32>
    %cst_18 = arith.constant dense<0.000000e+00> : vector<50x512xf32>
    %23 = tpu.matmul %22, %21, %cst_18 {dimension_numbers = #tpu.dot_dimension_numbers<[1], [0], [0], [1], [0, 0, 1, 1], [], []>} : vector<50x50xf32>, vector<50x512xf32>, vector<50x512xf32> -> vector<50x512xf32>
    %c0_19 = arith.constant 0 : index
    %c0_20 = arith.constant 0 : index
    %24 = vector.load %arg10[%c0_19, %c0_20] : memref<50x1xf32, #tpu.memory_space<vmem>>, vector<50x1xf32>
    %25 = vector.broadcast %24 : vector<50x1xf32> to vector<50x512xf32>
    %26 = arith.addf %23, %25 : vector<50x512xf32>
    %27 = arith.addf %26, %15 : vector<50x512xf32>
    %28 = math.tanh %27 : vector<50x512xf32>
    %c0_21 = arith.constant 0 : index
    %c0_22 = arith.constant 0 : index
    %29 = vector.load %arg11[%c0_21, %c0_22] : memref<1x50xf32, #tpu.memory_space<vmem>>, vector<1x50xf32>
    %cst_23 = arith.constant dense<0.000000e+00> : vector<1x512xf32>
    %30 = tpu.matmul %29, %28, %cst_23 {dimension_numbers = #tpu.dot_dimension_numbers<[1], [0], [0], [1], [0, 0, 1, 1], [], []>} : vector<1x50xf32>, vector<50x512xf32>, vector<1x512xf32> -> vector<1x512xf32>
    %c0_24 = arith.constant 0 : index
    %c0_25 = arith.constant 0 : index
    %31 = vector.load %arg12[%c0_24, %c0_25] : memref<1x1xf32, #tpu.memory_space<vmem>>, vector<1x1xf32>
    %32 = vector.broadcast %31 : vector<1x1xf32> to vector<1x512xf32>
    %33 = arith.addf %30, %32 : vector<1x512xf32>
    %cst_26 = arith.constant 0.000000e+00 : f32
    %34 = vector.broadcast %cst_26 : f32 to vector<1x512xf32>
    %35 = arith.maximumf %33, %34 : vector<1x512xf32>
    %36 = math.absf %33 : vector<1x512xf32>
    %cst_27 = arith.constant 0.000000e+00 : f32
    %37 = vector.broadcast %cst_27 : f32 to vector<1x512xf32>
    %38 = arith.subf %37, %36 : vector<1x512xf32>
    %39 = math.exp %38 : vector<1x512xf32>
    %40 = math.log1p %39 : vector<1x512xf32>
    %41 = arith.addf %35, %40 : vector<1x512xf32>
    %42 = vector.broadcast %0 : f32 to vector<1x512xf32>
    %43 = arith.mulf %42, %41 : vector<1x512xf32>
    %44 = vector.broadcast %1 : f32 to vector<1x512xf32>
    %45 = arith.addf %44, %43 : vector<1x512xf32>
    %46 = vector.broadcast %1 : f32 to vector<1x512xf32>
    %47 = arith.maximumf %46, %45 : vector<1x512xf32>
    %48 = vector.broadcast %2 : f32 to vector<1x512xf32>
    %49 = arith.minimumf %48, %47 : vector<1x512xf32>
    %c0_28 = arith.constant 0 : index
    %c0_29 = arith.constant 0 : index
    %50 = vector.load %arg13[%c0_28, %c0_29] : memref<1x512xf32, #tpu.memory_space<vmem>>, vector<1x512xf32>
    tpu.vector_store %arg13[%c0_28, %c0_29], %49 {strides = array<i32>} : memref<1x512xf32, #tpu.memory_space<vmem>>, vector<1x512xf32>,
    return
  }
  func.func @transform_0(%arg0: i32) -> i32 {
    %c0_i32 = arith.constant 0 : i32
    %c0_i32_0 = arith.constant 0 : i32
    return %c0_i32 : i32
  }
  func.func @transform_1(%arg0: i32) -> (i32, i32) {
    %c0_i32 = arith.constant 0 : i32
    %c0_i32_0 = arith.constant 0 : i32
    return %c0_i32, %arg0 : i32, i32
  }
  func.func @transform_2(%arg0: i32) -> (i32, i32) {
    %c0_i32 = arith.constant 0 : i32
    %c0_i32_0 = arith.constant 0 : i32
    %c0_i32_1 = arith.constant 0 : i32
    return %c0_i32, %c0_i32_0 : i32, i32
  }
  func.func @transform_3(%arg0: i32) -> (i32, i32) {
    %c0_i32 = arith.constant 0 : i32
    %c0_i32_0 = arith.constant 0 : i32
    %c0_i32_1 = arith.constant 0 : i32
    return %c0_i32, %c0_i32_0 : i32, i32
  }
  func.func @transform_4(%arg0: i32) -> (i32, i32) {
    %c0_i32 = arith.constant 0 : i32
    %c0_i32_0 = arith.constant 0 : i32
    %c0_i32_1 = arith.constant 0 : i32
    return %c0_i32, %c0_i32_0 : i32, i32
  }
  func.func @transform_5(%arg0: i32) -> (i32, i32) {
    %c0_i32 = arith.constant 0 : i32
    %c0_i32_0 = arith.constant 0 : i32
    %c0_i32_1 = arith.constant 0 : i32
    return %c0_i32, %c0_i32_0 : i32, i32
  }
  func.func @transform_6(%arg0: i32) -> (i32, i32) {
    %c0_i32 = arith.constant 0 : i32
    %c0_i32_0 = arith.constant 0 : i32
    %c0_i32_1 = arith.constant 0 : i32
    return %c0_i32, %c0_i32_0 : i32, i32
  }
  func.func @transform_7(%arg0: i32) -> (i32, i32) {
    %c0_i32 = arith.constant 0 : i32
    %c0_i32_0 = arith.constant 0 : i32
    %c0_i32_1 = arith.constant 0 : i32
    return %c0_i32, %c0_i32_0 : i32, i32
  }
  func.func @transform_8(%arg0: i32) -> (i32, i32) {
    %c0_i32 = arith.constant 0 : i32
    %c0_i32_0 = arith.constant 0 : i32
    %c0_i32_1 = arith.constant 0 : i32
    return %c0_i32, %c0_i32_0 : i32, i32
  }
  func.func @transform_9(%arg0: i32) -> (i32, i32) {
    %c0_i32 = arith.constant 0 : i32
    %c0_i32_0 = arith.constant 0 : i32
    %c0_i32_1 = arith.constant 0 : i32
    return %c0_i32, %c0_i32_0 : i32, i32
  }
  func.func @transform_10(%arg0: i32) -> (i32, i32) {
    %c0_i32 = arith.constant 0 : i32
    %c0_i32_0 = arith.constant 0 : i32
    %c0_i32_1 = arith.constant 0 : i32
    return %c0_i32, %c0_i32_0 : i32, i32
  }
  func.func @transform_11(%arg0: i32) -> (i32, i32) {
    %c0_i32 = arith.constant 0 : i32
    %c0_i32_0 = arith.constant 0 : i32
    %c0_i32_1 = arith.constant 0 : i32
    return %c0_i32, %c0_i32_0 : i32, i32
  }
  func.func @transform_12(%arg0: i32) -> (i32, i32) {
    %c0_i32 = arith.constant 0 : i32
    %c0_i32_0 = arith.constant 0 : i32
    return %c0_i32, %arg0 : i32, i32
  }
}

</mosaic_0001>

<bundles_post_ra>
// kernel: _pinn_forward_impl.1
= control target key start
LH: loop header
LB: loop body
LE: loop exit
PB: predicated region body
PF: predicated region fallthrough
CT: control target
= control target key end

     0   :  { %s3145_s0 = inlined_call_operand.vmem [shape: f32[3], index: 0, kind: input, shape index: {}]   ;;  %s3146_s1 = inlined_call_operand.vmem [shape: f32[4,1024], index: 1, kind: input, shape index: {}]   ;;  %s3147_s2 = inlined_call_operand.vmem [shape: f32[50,4], index: 2, kind: input, shape index: {}]   ;;  %s3148_s3 = inlined_call_operand.vmem [shape: f32[50,1], index: 3, kind: input, shape index: {}]   ;;  %s3149_s4 = inlined_call_operand.vmem [shape: f32[50,50], index: 4, kind: input, shape index: {}]   ;;  %s3150_s5 = inlined_call_operand.vmem [shape: f32[50,1], index: 5, kind: input, shape index: {}]   ;;  %s3151_s6 = inlined_call_operand.vmem [shape: f32[50,50], index: 6, kind: input, shape index: {}]   ;;  %s3152_s7 = inlined_call_operand.vmem [shape: f32[50,1], index: 7, kind: input, shape index: {}]   ;;  %s3153_s8 = inlined_call_operand.vmem [shape: f32[50,50], index: 8, kind: input, shape index: {}]   ;;  %s3154_s9 = inlined_call_operand.vmem [shape: f32[50,1], index: 9, kind: input, shape index: {}]   ;;  %s3155_s10 = inlined_call_operand.vmem [shape: f32[1,50], index: 10, kind: input, shape index: {}]   ;;  %s3156_s11 = inlined_call_operand.<no memory space> [shape: f32[1,1], index: 11, kind: input, shape index: {}]   ;;  %s3157_s12 = inlined_call_operand.vmem [shape: f32[1,1024], index: 12, kind: output, shape index: {}]  }
   0x1   :  { %v17_v0 = vstv %s3156_s11 }
   0x2   :  { %18 = vst [vmem:[#allocation2] sm:$0x1] %v17_v0 }
   0x3   :  { %19 = vsyncpa [#allocation4], 0  ;;  %s2660_s23 = smov 0  }
   0x4 LB: > { %s2107_s24 = sadd.s32 4294967295, %s2586_s23   ;;  %p2109_p0 = scmp.ge.s32.totalorder %s2586_s23, 1  ;;  %s2586_s23 = sphi %s2660_s23, %s25_s23  }
   0x5   : > { %p313_p1 = scmp.lt.s32.totalorder %s2586_s23, 3  ;;  %s326_s27 = sshll.u32 %s3145_s0, 4  ;;  %s327_s27 = int_to_ptr.vmem [resolvable:$true] %s326_s27 }
   0x6   : > { %p2675_p3 = scmp.eq.s32.totalorder %s2107_s24, 0  ;;  %s2561_s29 = scalar_lea.vmem %s327_s27, 16 }
   0x7   : > { %p2671_p2 = pnand %p2109_p0, %p313_p1  ;;  %p2562_p6 = scmp.ne.s32.totalorder %s327_s27, %s2561_s29 }
   0x8   : > { %p2569_p10 = scmp.lt.s32.totalorder %s327_s27, %s327_s27  ;;  %p2570_p11 = scmp.lt.s32.totalorder %s2561_s29, %s2561_s29 }
   0x9   : > { %p2299_p4 = pneg %p2671_p2 }
   0xa   : > { %p2571_p12 = por %p2570_p11, %p2569_p10 }
   0xb   : > { %p2300_p5 = pnand %p2675_p3, %p2299_p4 }
   0xd   : > { %p2563_p7 = pneg %p2300_p5 }
   0xf   : > { %p2564_p8 = pnand %p2563_p7, %p2562_p6 }
  0x11   : > { %p2565_p9 = pneg %p2564_p8 }
  0x13   : > { %p2572_p13 = pnand %p2571_p12, %p2565_p9 }
  0x15   : > { %2575 = shalt.err (!%p2572_p13)
}
  0x16   : > { %s2588_s30 = smov [#allocation3]   ;;  %378 = sbr.rel (%p2671_p2) target bundleno = 1337 (0x539), region = 68 }
  0x17   : > { %2302 = dma.vmem_to_smem (!%p2300_p5), %s327_s27, 16, %s2588_s30, [#allocation4]  }
  0x1d   : > { %2581 = dma.done.wait (%p2675_p3), [#allocation4], 16  }
  0x1e   : > { %2583 = vsyncadd (%p2675_p3), [#allocation4], 4294967280 }
  0x1f   : > { %384 = sfence }
  0x20   : > { %s2114_s13 = sshll.u32 %s2107_s24, 2  ;;  %v2589_v1 = vmov 0.0   ;;  %v2590_v2 = vmov 0   ;;  %v443_v3 = vld [vmem:[%s3148_s3] sm:$0xff]  ;;  %v445_v4 = vld [vmem:[%s3148_s3 + $0x10] sm:$0xff]  ;;  %v444_v5 = vld [vmem:[%s3148_s3 + $0x8] sm:$0xff] }
  0x21   : > { %p421_p0 = scmp.lt.s32.totalorder %s2114_s13, 7  ;;  %584 = vmatprep.mubr.f32.mxu0 %v2589_v1  ;;  %691 = vmatprep.mubr.f32.mxu1 %v2589_v1  ;;  %v446_v6 = vld [vmem:[%s3148_s3 + $0x18] sm:$0xff]  ;;  %vm511_vm0 = vcmask 1043456   ;;  %v436_v11 = vld [vmem:[%s3147_s2] sm:$0xff]  ;;  %vm489_vm1 = vcmask 31744   ;;  %v448_v13 = vld [vmem:[%s3148_s3 + $0x28] sm:$0xff] }
  0x22   : > { %2317 = vset.pattern.permute.xlu0 %v2590_v2  ;;  %2318 = vset.pattern.permute.xlu1 %v2590_v2  ;;  %v447_v12 = vld [vmem:[%s3148_s3 + $0x20] sm:$0xff]  ;;  %v437_v14 = vld [vmem:[%s3147_s2 + $0x8] sm:$0xff]  ;;  %v449_v15 = vld [vmem:[%s3148_s3 + $0x30] sm:$0x3]  ;;  %vm833_vm2 = vcmask 1041408   ;;  %vm811_vm3 = vcmask 408576  }
  0x23   : > { %s3161_s13 = smov (!%p421_p0, %s2114_s13), 7  ;;  %452 = vperm.xlu0 %2317, %v443_v3   ;;  %462 = vperm.xlu1 %2318, %v445_v4   ;;  %v769_v16 = vld [vmem:[%s3150_s5] sm:$0xff]  ;;  %v438_v17 = vld [vmem:[%s3147_s2 + $0x10] sm:$0xff]  ;;  %v770_v18 = vld [vmem:[%s3150_s5 + $0x8] sm:$0xff]  ;;  %s431_s30 = sld [smem:[#allocation3]] }
  0x24   : > { %s2115_s20 = sshll.u32 %s3161_s13, 2  ;;  %v771_v19 = vld [vmem:[%s3150_s5 + $0x10] sm:$0xff]  ;;  %v439_v20 = vld [vmem:[%s3147_s2 + $0x18] sm:$0xff]  ;;  %v773_v22 = vld [vmem:[%s3150_s5 + $0x20] sm:$0xff]  ;;  %s2117_s14 = sld [smem:[#allocation3 + $0x1]] }
  0x25   : > { %s424_s26 = scalar_lea.vmem %s3146_s1, %s2115_s20  ;;  %v772_v21 = vld [vmem:[%s3150_s5 + $0x18] sm:$0xff]  ;;  %v440_v23 = vld [vmem:[%s3147_s2 + $0x20] sm:$0xff]  ;;  %v774_v24 = vld [vmem:[%s3150_s5 + $0x28] sm:$0xff]  ;;  %s3130_s15 = sld [smem:[#allocation3 + $0x2]] }
  0x26   : > { %v434_v7 = vld [vmem:[%s424_s26] sm:$0xff]  ;;  %v435_v8 = vld [vmem:[%s424_s26 + $0x8] sm:$0xff]  ;;  %v775_v25 = vld [vmem:[%s3150_s5 + $0x30] sm:$0x3]  ;;  %s429_s18 = scalar_lea.vmem %s3157_s12, %s3161_s13 }
  0x27   : > { %457 = vperm.xlu0 %2317, %v444_v5   ;;  %v487_v9 = vcombine.high %v434_v7, %v434_v7  ;;  %v488_v10 = vcombine.high %v435_v8, %v435_v8  ;;  %467 = vperm.xlu1 %2318, %v446_v6   ;;  %v441_v26 = vld [vmem:[%s3147_s2 + $0x28] sm:$0xff]  ;;  %v1095_v27 = vld [vmem:[%s3152_s7] sm:$0xff]  ;;  %v442_v29 = vld [vmem:[%s3147_s2 + $0x30] sm:$0x3] }
  0x28   : > { %v1096_v28 = vld [vmem:[%s3152_s7 + $0x8] sm:$0xff]  ;;  %v1097_v30 = vld [vmem:[%s3152_s7 + $0x10] sm:$0xff]  ;;  %v1098_v31 = vld [vmem:[%s3152_s7 + $0x18] sm:$0xff] }
  0x29   : > { %2119 = vmatprep.subr.msk.mxu0 %vm511_vm0, %v487_v9  ;;  %2128 = vmatprep.subr.msk.mxu1 %vm511_vm0, %v488_v10  ;;  %v1099_v32 = vld [vmem:[%s3152_s7 + $0x20] sm:$0xff]  ;;  %v1100_v33 = vld [vmem:[%s3152_s7 + $0x28] sm:$0xff]  ;;  %v1101_v34 = vld [vmem:[%s3152_s7 + $0x30] sm:$0x3] }
  0x2a   : > { %2120 = vmatpush1.msk.msra.mxu0 %vm511_vm0, %v434_v7  ;;  %2129 = vmatpush1.msk.msra.mxu1 %vm511_vm0, %v435_v8  ;;  %v1419_v35 = vld [vmem:[%s3154_s9] sm:$0xff]  ;;  %v1420_v36 = vld [vmem:[%s3154_s9 + $0x8] sm:$0xff]  ;;  %v1421_v37 = vld [vmem:[%s3154_s9 + $0x10] sm:$0xff] }
  0x2b   : > { %2121 = vmatmul.mubr.msk.f32.vlgmr.msra.gmra.mrb[0].mxu0 %vm489_vm1, %v436_v11  ;;  %2130 = vmatmul.mubr.msk.f32.vlgmr.msra.gmra.mrb[0].mxu1 %vm489_vm1, %v436_v11  ;;  %v1422_v38 = vld [vmem:[%s3154_s9 + $0x18] sm:$0xff]  ;;  %v1423_v39 = vld [vmem:[%s3154_s9 + $0x20] sm:$0xff]  ;;  %v1424_v40 = vld [vmem:[%s3154_s9 + $0x28] sm:$0xff] }
  0x2c   : > { %590 = vmatprep.mubr.f32.mxu0 %v2589_v1  ;;  %697 = vmatprep.mubr.f32.mxu1 %v2589_v1  ;;  %v1425_v41 = vld [vmem:[%s3154_s9 + $0x30] sm:$0x3]  ;;  %v1765_v42 = vld [vmem:[#allocation2] sm:$0x1] }
  0x2d   : > { %472 = vperm.xlu0 %2317, %v447_v12   ;;  %477 = vperm.xlu1 %2318, %v448_v13  }
  0x2f   : > { %2122 = vmatmul.mubr.msk.f32.gmra.mrb[2].mxu0 %vm489_vm1, %v437_v14  ;;  %2131 = vmatmul.mubr.msk.f32.gmra.mrb[2].mxu1 %vm489_vm1, %v437_v14 }
  0x30   : > { %596 = vmatprep.mubr.f32.mxu0 %v2589_v1  ;;  %703 = vmatprep.mubr.f32.mxu1 %v2589_v1 }
  0x31   : > { %482 = vperm.xlu0 %2317, %v449_v15   ;;  %778 = vperm.xlu1 %2318, %v769_v16  }
  0x33   : > { %2123 = vmatmul.mubr.msk.f32.gmra.mrb[4].mxu0 %vm489_vm1, %v438_v17  ;;  %2132 = vmatmul.mubr.msk.f32.gmra.mrb[4].mxu1 %vm489_vm1, %v438_v17 }
  0x34   : > { %602 = vmatprep.mubr.f32.mxu0 %v2589_v1  ;;  %709 = vmatprep.mubr.f32.mxu1 %v2589_v1 }
  0x35   : > { %783 = vperm.xlu0 %2317, %v770_v18   ;;  %788 = vperm.xlu1 %2318, %v771_v19  }
  0x37   : > { %2124 = vmatmul.mubr.msk.f32.gmra.mrb[6].mxu0 %vm489_vm1, %v439_v20  ;;  %2133 = vmatmul.mubr.msk.f32.gmra.mrb[6].mxu1 %vm489_vm1, %v439_v20 }
  0x38   : > { %608 = vmatprep.mubr.f32.mxu0 %v2589_v1  ;;  %715 = vmatprep.mubr.f32.mxu1 %v2589_v1 }
  0x39   : > { %793 = vperm.xlu0 %2317, %v772_v21   ;;  %798 = vperm.xlu1 %2318, %v773_v22  }
  0x3b   : > { %2125 = vmatmul.mubr.msk.f32.gmra.mrb[8].mxu0 %vm489_vm1, %v440_v23  ;;  %2134 = vmatmul.mubr.msk.f32.gmra.mrb[8].mxu1 %vm489_vm1, %v440_v23 }
  0x3c   : > { %614 = vmatprep.mubr.f32.mxu0 %v2589_v1  ;;  %721 = vmatprep.mubr.f32.mxu1 %v2589_v1 }
  0x3d   : > { %803 = vperm.xlu0 %2317, %v774_v24   ;;  %808 = vperm.xlu1 %2318, %v775_v25  }
  0x3f   : > { %2126 = vmatmul.mubr.msk.f32.gmra.mrb[10].mxu0 %vm489_vm1, %v441_v26  ;;  %2135 = vmatmul.mubr.msk.f32.gmra.mrb[10].mxu1 %vm489_vm1, %v441_v26 }
  0x40   : > { %620 = vmatprep.mubr.f32.mxu0 %v2589_v1  ;;  %727 = vmatprep.mubr.f32.mxu1 %v2589_v1 }
  0x41   : > { %1104 = vperm.xlu0 %2317, %v1095_v27   ;;  %1109 = vperm.xlu1 %2318, %v1096_v28  }
  0x43   : > { %2127 = vmatmul.mubr.msk.f32.gmra.mrb[12].mxu0 %vm489_vm1, %v442_v29  ;;  %2136 = vmatmul.mubr.msk.f32.gmra.mrb[12].mxu1 %vm489_vm1, %v442_v29 }
  0x44   : > { %910 = vmatprep.mubr.f32.mxu0 %v2589_v1  ;;  %1017 = vmatprep.mubr.f32.mxu1 %v2589_v1 }
  0x45   : > { %1114 = vperm.xlu0 %2317, %v1097_v30   ;;  %1119 = vperm.xlu1 %2318, %v1098_v31  }
  0x49   : > { %1124 = vperm.xlu0 %2317, %v1099_v32   ;;  %1129 = vperm.xlu1 %2318, %v1100_v33  }
  0x4d   : > { %1134 = vperm.xlu0 %2317, %v1101_v34   ;;  %1428 = vperm.xlu1 %2318, %v1419_v35  }
  0x51   : > { %1433 = vperm.xlu0 %2317, %v1420_v36   ;;  %1438 = vperm.xlu1 %2318, %v1421_v37  }
  0x55   : > { %1443 = vperm.xlu0 %2317, %v1422_v38   ;;  %1448 = vperm.xlu1 %2318, %v1423_v39  }
  0x59   : > { %1453 = vperm.xlu0 %2317, %v1424_v40   ;;  %1458 = vperm.xlu1 %2318, %v1425_v41  }
  0x5d   : > { %1768 = vperm.xlu0 %2317, %v1765_v42  }
  0xa2   : > { %v453_v43 = vpop.permute.xlu0 %452  ;;  %v463_v53 = vpop.permute.xlu1 %462 }
  0xa6   : > { %v458_v52 = vpop.permute.xlu0 %457  ;;  %v468_v7 = vpop.permute.xlu1 %467 }
  0xac   : > { %v473_v19 = vpop.permute.xlu0 %472  ;;  %v478_v33 = vpop.permute.xlu1 %477 }
  0xfe   : > { %v586_v44 = vpop.f32.mrb[0].mxu0  ;;  %v693_v45 = vpop.f32.mrb[0].mxu1 }
  0xff   : > { %v587_v46 = vadd.f32 %v586_v44, %v453_v43  ;;  %v694_v47 = vadd.f32 %v693_v45, %v453_v43  ;;  %v588_v48 = vpop.f32.mrb[1].mxu0  ;;  %v695_v49 = vpop.f32.mrb[1].mxu1 }
 0x100   : > { %v589_v50 = vadd.f32 %v588_v48, %v453_v43  ;;  %v696_v51 = vadd.f32 %v695_v49, %v453_v43  ;;  %v483_v49 = vpop.permute.xlu0 %482 }
 0x101   : > { %2321 = vtanh.f32 %v587_v46 }
 0x102   : > { %2323 = vtanh.f32 %v694_v47  ;;  %v592_v54 = vpop.f32.mrb[2].mxu0  ;;  %v699_v55 = vpop.f32.mrb[2].mxu1 }
 0x103   : > { %2325 = vtanh.f32 %v589_v50  ;;  %v593_v56 = vadd.f32 %v592_v54, %v458_v52  ;;  %v700_v57 = vadd.f32 %v699_v55, %v458_v52  ;;  %v594_v58 = vpop.f32.mrb[3].mxu0  ;;  %v701_v59 = vpop.f32.mrb[3].mxu1 }
 0x104   : > { %2327 = vtanh.f32 %v696_v51  ;;  %v595_v60 = vadd.f32 %v594_v58, %v458_v52  ;;  %v702_v61 = vadd.f32 %v701_v59, %v458_v52 }
 0x105   : > { %2329 = vtanh.f32 %v593_v56 }
 0x106   : > { %2331 = vtanh.f32 %v700_v57  ;;  %v598_v62 = vpop.f32.mrb[4].mxu0  ;;  %v705_v63 = vpop.f32.mrb[4].mxu1 }
 0x107   : > { %2333 = vtanh.f32 %v595_v60  ;;  %v599_v0 = vadd.f32 %v598_v62, %v463_v53  ;;  %v706_v2 = vadd.f32 %v705_v63, %v463_v53  ;;  %v600_v3 = vpop.f32.mrb[5].mxu0  ;;  %v707_v4 = vpop.f32.mrb[5].mxu1 }
 0x108   : > { %2335 = vtanh.f32 %v702_v61  ;;  %v601_v5 = vadd.f32 %v600_v3, %v463_v53  ;;  %v708_v6 = vadd.f32 %v707_v4, %v463_v53 }
 0x109   : > { %2337 = vtanh.f32 %v599_v0 }
 0x10a   : > { %2339 = vtanh.f32 %v706_v2  ;;  %v604_v8 = vpop.f32.mrb[6].mxu0  ;;  %v711_v9 = vpop.f32.mrb[6].mxu1 }
 0x10b   : > { %v2322_v10 = vpop.eup %2321  ;;  %2341 = vtanh.f32 %v601_v5  ;;  %v605_v11 = vadd.f32 %v604_v8, %v468_v7  ;;  %v712_v12 = vadd.f32 %v711_v9, %v468_v7  ;;  %v606_v13 = vpop.f32.mrb[7].mxu0 }
 0x10c   : > { %v713_v14 = vpop.f32.mrb[7].mxu1  ;;  %v2324_v15 = vpop.eup %2323  ;;  %2343 = vtanh.f32 %v708_v6  ;;  %v607_v16 = vadd.f32 %v606_v13, %v468_v7 }
 0x10d   : > { %v714_v17 = vadd.f32 %v713_v14, %v468_v7  ;;  %v2326_v18 = vpop.eup %2325  ;;  %2345 = vtanh.f32 %v605_v11 }
 0x10e   : > { %v2328_v20 = vpop.eup %2327  ;;  %2347 = vtanh.f32 %v712_v12  ;;  %v610_v21 = vpop.f32.mrb[8].mxu0 }
 0x10f   : > { %v717_v22 = vpop.f32.mrb[8].mxu1  ;;  %v2330_v23 = vpop.eup %2329  ;;  %2349 = vtanh.f32 %v607_v16  ;;  %v611_v24 = vadd.f32 %v610_v21, %v473_v19  ;;  %v763_v21 = vld [vmem:[%s3149_s4 + $0x8] sm:$0xff] }
 0x110   : > { %v718_v25 = vadd.f32 %v717_v22, %v473_v19  ;;  %v612_v26 = vpop.f32.mrb[9].mxu0  ;;  %v719_v27 = vpop.f32.mrb[9].mxu1  ;;  %2351 = vtanh.f32 %v714_v17  ;;  %v2201_v31 = vpack.c.bf16 %v2330_v23, %v2322_v10  ;;  %v764_v22 = vld [vmem:[%s3149_s4 + $0x10] sm:$0xff]  ;;  %v765_v23 = vld [vmem:[%s3149_s4 + $0x18] sm:$0xff] }
 0x111   : > { %v2332_v28 = vpop.eup %2331  ;;  %v613_v29 = vadd.f32 %v612_v26, %v473_v19  ;;  %v720_v30 = vadd.f32 %v719_v27, %v473_v19  ;;  %2353 = vtanh.f32 %v611_v24  ;;  %v766_v24 = vld [vmem:[%s3149_s4 + $0x20] sm:$0xff]  ;;  %v768_v26 = vld [vmem:[%s3149_s4 + $0x30] sm:$0x3]  ;;  %v779_v27 = vpop.permute.xlu1 %778 }
 0x112   : > { %v2334_v32 = vpop.eup %2333  ;;  %v2213_v34 = vpack.c.bf16 %v2332_v28, %v2324_v15  ;;  %2355 = vtanh.f32 %v718_v25  ;;  %v616_v36 = vpop.f32.mrb[10].mxu0  ;;  %v767_v25 = vld [vmem:[%s3149_s4 + $0x28] sm:$0xff] }
 0x113   : > { %v2336_v35 = vpop.eup %2335  ;;  %v723_v37 = vpop.f32.mrb[10].mxu1  ;;  %v2199_v38 = vpack.c.bf16 %v2334_v32, %v2326_v18  ;;  %2357 = vtanh.f32 %v613_v29  ;;  %v617_v40 = vadd.f32 %v616_v36, %v478_v33  ;;  %v762_v18 = vld [vmem:[%s3149_s4] sm:$0xff] }
 0x114   : > { %v2338_v39 = vpop.eup %2337  ;;  %v724_v41 = vadd.f32 %v723_v37, %v478_v33  ;;  %v618_v42 = vpop.f32.mrb[11].mxu0  ;;  %v2211_v44 = vpack.c.bf16 %v2336_v35, %v2328_v20  ;;  %2359 = vtanh.f32 %v720_v30 }
 0x115   : > { %v725_v43 = vpop.f32.mrb[11].mxu1  ;;  %v2340_v45 = vpop.eup %2339  ;;  %v619_v46 = vadd.f32 %v618_v42, %v478_v33  ;;  %2200 = vmatprep.subr.bf16.mxu0 %v2199_v38  ;;  %2361 = vtanh.f32 %v617_v40 }
 0x116   : > { %v726_v47 = vadd.f32 %v725_v43, %v478_v33  ;;  %v2342_v48 = vpop.eup %2341  ;;  %2212 = vmatprep.subr.bf16.mxu1 %v2211_v44  ;;  %2202 = vmatpush1.bf16.msra.mxu0 %v2201_v31  ;;  %2363 = vtanh.f32 %v724_v41  ;;  %v622_v51 = vpop.f32.mrb[12].mxu0 }
 0x117   : > { %v2344_v50 = vpop.eup %2343  ;;  %2214 = vmatpush1.bf16.msra.mxu1 %v2213_v34  ;;  %v729_v52 = vpop.f32.mrb[12].mxu1  ;;  %2365 = vtanh.f32 %v619_v46  ;;  %v623_v63 = vadd.f32 %v622_v51, %v483_v49 }
 0x118   : > { %v2346_v53 = vpop.eup %2345  ;;  %v624_v54 = vpop.f32.mrb[13].mxu0  ;;  %2367 = vtanh.f32 %v726_v47  ;;  %v730_v3 = vadd.f32 %v729_v52, %v483_v49 }
 0x119   : > { %v731_v55 = vpop.f32.mrb[13].mxu1  ;;  %v2348_v56 = vpop.eup %2347  ;;  %v625_v57 = vadd.f32 %v624_v54, %v483_v49  ;;  %v2205_v59 = vpack.c.bf16 %v2346_v53, %v2338_v39 }
 0x11a   : > { %v732_v58 = vadd.f32 %v731_v55, %v483_v49  ;;  %v2350_v60 = vpop.eup %2349  ;;  %v2217_v61 = vpack.c.bf16 %v2348_v56, %v2340_v45  ;;  %v784_v35 = vpop.permute.xlu0 %783 }
 0x11b   : > { %v2352_v62 = vpop.eup %2351  ;;  %v2203_v0 = vpack.c.bf16 %v2350_v60, %v2342_v48  ;;  %2369 = vtanh.f32 %v625_v57  ;;  %v789_v45 = vpop.permute.xlu1 %788 }
 0x11c   : > { %v2354_v2 = vpop.eup %2353  ;;  %v2215_v4 = vpack.c.bf16 %v2352_v62, %v2344_v50  ;;  %2371 = vtanh.f32 %v732_v58 }
 0x11d   : > { %v2356_v5 = vpop.eup %2355  ;;  %2204 = vmatprep.subr.bf16.mxu0 %v2203_v0  ;;  %2373 = vtanh.f32 %v623_v63 }
 0x11e   : > { %v2358_v6 = vpop.eup %2357  ;;  %2216 = vmatprep.subr.bf16.mxu1 %v2215_v4  ;;  %2206 = vmatpush1.bf16.msra.mxu0 %v2205_v59  ;;  %2375 = vtanh.f32 %v730_v3  ;;  %v794_v53 = vpop.permute.xlu0 %793 }
 0x11f   : > { %v2360_v7 = vpop.eup %2359  ;;  %2218 = vmatpush1.bf16.msra.mxu1 %v2217_v61  ;;  %v799_v3 = vpop.permute.xlu1 %798 }
 0x120   : > { %v2362_v8 = vpop.eup %2361 }
 0x121   : > { %v2364_v9 = vpop.eup %2363  ;;  %v2209_v10 = vpack.c.bf16 %v2362_v8, %v2354_v2 }
 0x122   : > { %v2366_v11 = vpop.eup %2365  ;;  %v2221_v12 = vpack.c.bf16 %v2364_v9, %v2356_v5 }
 0x123   : > { %v2368_v13 = vpop.eup %2367  ;;  %v2207_v14 = vpack.c.bf16 %v2366_v11, %v2358_v6 }
 0x124   : > { %v2219_v15 = vpack.c.bf16 %v2368_v13, %v2360_v7 }
 0x125   : > { %2208 = vmatprep.subr.bf16.mxu0 %v2207_v14  ;;  %v2370_v16 = vpop.eup %2369 }
 0x126   : > { %2220 = vmatprep.subr.bf16.mxu1 %v2219_v15  ;;  %2210 = vmatpush1.bf16.msra.mxu0 %v2209_v10  ;;  %v2372_v17 = vpop.eup %2371  ;;  %v804_v15 = vpop.permute.xlu0 %803 }
 0x127   : > { %2222 = vmatpush1.bf16.msra.mxu1 %v2221_v12  ;;  %2137 = vmatprep.subr.msk.mxu0 %vm833_vm2, %v2370_v16  ;;  %v2374_v19 = vpop.eup %2373 }
 0x128   : > { %2146 = vmatprep.subr.msk.mxu1 %vm833_vm2, %v2372_v17  ;;  %v2376_v20 = vpop.eup %2375 }
 0x12a   : > { %2138 = vmatpush1.msk.msra.mxu0 %vm833_vm2, %v2374_v19 }
 0x12b   : > { %2147 = vmatpush1.msk.msra.mxu1 %vm833_vm2, %v2376_v20  ;;  %2139 = vmatmul.mubr.msk.f32.vlgmr.msra.gmra.mrb[14].mxu0 %vm811_vm3, %v762_v18 }
 0x12c   : > { %2148 = vmatmul.mubr.msk.f32.vlgmr.msra.gmra.mrb[14].mxu1 %vm811_vm3, %v762_v18  ;;  %916 = vmatprep.mubr.f32.mxu0 %v2589_v1 }
 0x12d   : > { %1023 = vmatprep.mubr.f32.mxu1 %v2589_v1 }
 0x12f   : > { %2140 = vmatmul.mubr.msk.f32.gmra.mrb[16].mxu0 %vm811_vm3, %v763_v21 }
 0x130   : > { %2149 = vmatmul.mubr.msk.f32.gmra.mrb[16].mxu1 %vm811_vm3, %v763_v21  ;;  %922 = vmatprep.mubr.f32.mxu0 %v2589_v1 }
 0x131   : > { %1029 = vmatprep.mubr.f32.mxu1 %v2589_v1 }
 0x133   : > { %2141 = vmatmul.mubr.msk.f32.gmra.mrb[18].mxu0 %vm811_vm3, %v764_v22 }
 0x134   : > { %2150 = vmatmul.mubr.msk.f32.gmra.mrb[18].mxu1 %vm811_vm3, %v764_v22  ;;  %928 = vmatprep.mubr.f32.mxu0 %v2589_v1 }
 0x135   : > { %1035 = vmatprep.mubr.f32.mxu1 %v2589_v1 }
 0x137   : > { %2142 = vmatmul.mubr.msk.f32.gmra.mrb[20].mxu0 %vm811_vm3, %v765_v23 }
 0x138   : > { %2151 = vmatmul.mubr.msk.f32.gmra.mrb[20].mxu1 %vm811_vm3, %v765_v23  ;;  %934 = vmatprep.mubr.f32.mxu0 %v2589_v1 }
 0x139   : > { %1041 = vmatprep.mubr.f32.mxu1 %v2589_v1 }
 0x13b   : > { %2143 = vmatmul.mubr.msk.f32.gmra.mrb[22].mxu0 %vm811_vm3, %v766_v24 }
 0x13c   : > { %2152 = vmatmul.mubr.msk.f32.gmra.mrb[22].mxu1 %vm811_vm3, %v766_v24  ;;  %940 = vmatprep.mubr.f32.mxu0 %v2589_v1 }
 0x13d   : > { %1047 = vmatprep.mubr.f32.mxu1 %v2589_v1 }
 0x13f   : > { %2144 = vmatmul.mubr.msk.f32.gmra.mrb[24].mxu0 %vm811_vm3, %v767_v25 }
 0x140   : > { %2153 = vmatmul.mubr.msk.f32.gmra.mrb[24].mxu1 %vm811_vm3, %v767_v25  ;;  %946 = vmatprep.mubr.f32.mxu0 %v2589_v1 }
 0x141   : > { %1053 = vmatprep.mubr.f32.mxu1 %v2589_v1 }
 0x143   : > { %2145 = vmatmul.mubr.msk.f32.gmra.mrb[26].mxu0 %vm811_vm3, %v768_v26 }
 0x144   : > { %2154 = vmatmul.mubr.msk.f32.gmra.mrb[26].mxu1 %vm811_vm3, %v768_v26  ;;  %1234 = vmatprep.mubr.f32.mxu0 %v2589_v1 }
 0x145   : > { %1341 = vmatprep.mubr.f32.mxu1 %v2589_v1 }
 0x1fe   : > { %v912_v28 = vpop.f32.mrb[14].mxu0 }
 0x1ff   : > { %v913_v29 = vadd.f32 %v912_v28, %v779_v27  ;;  %v1019_v30 = vpop.f32.mrb[14].mxu1  ;;  %v914_v31 = vpop.f32.mrb[15].mxu0 }
 0x200   : > { %v915_v32 = vadd.f32 %v914_v31, %v779_v27  ;;  %v1021_v33 = vpop.f32.mrb[15].mxu1  ;;  %v1020_v43 = vadd.f32 %v1019_v30, %v779_v27 }
 0x201   : > { %v1022_v34 = vadd.f32 %v1021_v33, %v779_v27  ;;  %2377 = vtanh.f32 %v913_v29  ;;  %v809_v33 = vpop.permute.xlu1 %808 }
 0x202   : > { %v918_v36 = vpop.f32.mrb[16].mxu0  ;;  %2379 = vtanh.f32 %v915_v32 }
 0x203   : > { %v919_v37 = vadd.f32 %v918_v36, %v784_v35  ;;  %v1025_v38 = vpop.f32.mrb[16].mxu1  ;;  %v920_v39 = vpop.f32.mrb[17].mxu0  ;;  %2381 = vtanh.f32 %v1022_v34 }
 0x204   : > { %v1026_v40 = vadd.f32 %v1025_v38, %v784_v35  ;;  %v921_v41 = vadd.f32 %v920_v39, %v784_v35  ;;  %v1027_v42 = vpop.f32.mrb[17].mxu1 }
 0x205   : > { %2383 = vtanh.f32 %v919_v37  ;;  %v1028_v44 = vadd.f32 %v1027_v42, %v784_v35 }
 0x206   : > { %2385 = vtanh.f32 %v1026_v40  ;;  %v924_v46 = vpop.f32.mrb[18].mxu0 }
 0x207   : > { %2387 = vtanh.f32 %v921_v41  ;;  %v925_v47 = vadd.f32 %v924_v46, %v789_v45  ;;  %v1031_v48 = vpop.f32.mrb[18].mxu1  ;;  %v926_v49 = vpop.f32.mrb[19].mxu0 }
 0x208   : > { %2389 = vtanh.f32 %v1028_v44  ;;  %v927_v50 = vadd.f32 %v926_v49, %v789_v45  ;;  %v1033_v51 = vpop.f32.mrb[19].mxu1  ;;  %v1032_v63 = vadd.f32 %v1031_v48, %v789_v45 }
 0x209   : > { %2391 = vtanh.f32 %v1020_v43  ;;  %v1034_v52 = vadd.f32 %v1033_v51, %v789_v45 }
 0x20a   : > { %2393 = vtanh.f32 %v925_v47  ;;  %v930_v54 = vpop.f32.mrb[20].mxu0 }
 0x20b   : > { %2395 = vtanh.f32 %v927_v50  ;;  %v931_v55 = vadd.f32 %v930_v54, %v794_v53  ;;  %v1037_v56 = vpop.f32.mrb[20].mxu1  ;;  %v932_v57 = vpop.f32.mrb[21].mxu0 }
 0x20c   : > { %v2883_v58 = vpop.eup %2377  ;;  %2397 = vtanh.f32 %v1034_v52  ;;  %v1038_v59 = vadd.f32 %v1037_v56, %v794_v53  ;;  %v933_v60 = vadd.f32 %v932_v57, %v794_v53  ;;  %v1039_v61 = vpop.f32.mrb[21].mxu1 }
 0x20d   : > { %v2885_v62 = vpop.eup %2379  ;;  %2399 = vtanh.f32 %v931_v55  ;;  %v1040_v0 = vadd.f32 %v1039_v61, %v794_v53 }
 0x20e   : > { %v2887_v2 = vpop.eup %2381  ;;  %2401 = vtanh.f32 %v1038_v59  ;;  %v936_v4 = vpop.f32.mrb[22].mxu0 }
 0x20f   : > { %v2889_v5 = vpop.eup %2383  ;;  %2403 = vtanh.f32 %v933_v60  ;;  %v937_v6 = vadd.f32 %v936_v4, %v799_v3  ;;  %v1043_v7 = vpop.f32.mrb[22].mxu1 }
 0x210   : > { %v938_v8 = vpop.f32.mrb[23].mxu0  ;;  %v2891_v9 = vpop.eup %2385  ;;  %2405 = vtanh.f32 %v1040_v0  ;;  %v2225_v23 = vpack.c.bf16 %v2889_v5, %v2883_v58  ;;  %v1044_v30 = vadd.f32 %v1043_v7, %v799_v3 }
 0x211   : > { %v939_v10 = vadd.f32 %v938_v8, %v799_v3  ;;  %v1045_v11 = vpop.f32.mrb[23].mxu1  ;;  %v2893_v12 = vpop.eup %2387  ;;  %2407 = vtanh.f32 %v1032_v63 }
 0x212   : > { %v1046_v13 = vadd.f32 %v1045_v11, %v799_v3  ;;  %v2895_v14 = vpop.eup %2389  ;;  %2409 = vtanh.f32 %v937_v6  ;;  %v942_v16 = vpop.f32.mrb[24].mxu0  ;;  %v2223_v17 = vpack.c.bf16 %v2893_v12, %v2885_v62  ;;  %v1088_v6 = vld [vmem:[%s3151_s6] sm:$0xff]  ;;  %v1090_v11 = vld [vmem:[%s3151_s6 + $0x10] sm:$0xff] }
 0x213   : > { %v2899_v18 = vpop.eup %2391  ;;  %2411 = vtanh.f32 %v939_v10  ;;  %v943_v19 = vadd.f32 %v942_v16, %v804_v15  ;;  %v1049_v20 = vpop.f32.mrb[24].mxu1  ;;  %v2235_v22 = vpack.c.bf16 %v2895_v14, %v2887_v2  ;;  %v1089_v10 = vld [vmem:[%s3151_s6 + $0x8] sm:$0xff] }
 0x214   : > { %v944_v21 = vpop.f32.mrb[25].mxu0  ;;  %v2905_v24 = vpop.eup %2393  ;;  %2413 = vtanh.f32 %v1046_v13  ;;  %v1050_v25 = vadd.f32 %v1049_v20, %v804_v15  ;;  %2224 = vmatprep.subr.bf16.mxu0 %v2223_v17  ;;  %v2237_v28 = vpack.c.bf16 %v2891_v9, %v2899_v18  ;;  %v1091_v13 = vld [vmem:[%s3151_s6 + $0x18] sm:$0xff]  ;;  %v1093_v16 = vld [vmem:[%s3151_s6 + $0x28] sm:$0xff]  ;;  %v1094_v17 = vld [vmem:[%s3151_s6 + $0x30] sm:$0x3] }
 0x215   : > { %v945_v26 = vadd.f32 %v944_v21, %v804_v15  ;;  %v1051_v27 = vpop.f32.mrb[25].mxu1  ;;  %v2909_v29 = vpop.eup %2395  ;;  %2415 = vtanh.f32 %v943_v19  ;;  %2236 = vmatprep.subr.bf16.mxu1 %v2235_v22  ;;  %2226 = vmatpush1.bf16.msra.mxu0 %v2225_v23 }
 0x216   : > { %v1052_v31 = vadd.f32 %v1051_v27, %v804_v15  ;;  %v2911_v32 = vpop.eup %2397  ;;  %2417 = vtanh.f32 %v1050_v25  ;;  %2238 = vmatpush1.bf16.msra.mxu1 %v2237_v28  ;;  %v948_v34 = vpop.f32.mrb[26].mxu0  ;;  %v1092_v15 = vld [vmem:[%s3151_s6 + $0x20] sm:$0xff] }
 0x217   : > { %v2913_v35 = vpop.eup %2399  ;;  %2419 = vtanh.f32 %v945_v26  ;;  %v1055_v36 = vpop.f32.mrb[26].mxu1  ;;  %v949_v44 = vadd.f32 %v948_v34, %v809_v33 }
 0x218   : > { %v950_v37 = vpop.f32.mrb[27].mxu0  ;;  %v2915_v38 = vpop.eup %2401  ;;  %2421 = vtanh.f32 %v1052_v31  ;;  %v1056_v47 = vadd.f32 %v1055_v36, %v809_v33  ;;  %v2229_v49 = vpack.c.bf16 %v2913_v35, %v2905_v24 }
 0x219   : > { %v951_v39 = vadd.f32 %v950_v37, %v809_v33  ;;  %v1057_v40 = vpop.f32.mrb[27].mxu1  ;;  %v2917_v41 = vpop.eup %2403  ;;  %2423 = vtanh.f32 %v1044_v30 }
 0x21a   : > { %v1058_v42 = vadd.f32 %v1057_v40, %v809_v33  ;;  %v2919_v43 = vpop.eup %2405  ;;  %v2227_v45 = vpack.c.bf16 %v2917_v41, %v2909_v29  ;;  %v1105_v19 = vpop.permute.xlu0 %1104 }
 0x21b   : > { %v2923_v46 = vpop.eup %2407  ;;  %2425 = vtanh.f32 %v951_v39  ;;  %v2239_v48 = vpack.c.bf16 %v2919_v43, %v2911_v32  ;;  %v1110_v30 = vpop.permute.xlu1 %1109 }
 0x21c   : > { %v2929_v50 = vpop.eup %2409  ;;  %2427 = vtanh.f32 %v1058_v42  ;;  %2228 = vmatprep.subr.bf16.mxu0 %v2227_v45  ;;  %v2241_v51 = vpack.c.bf16 %v2915_v38, %v2923_v46 }
 0x21d   : > { %v2933_v52 = vpop.eup %2411  ;;  %2240 = vmatprep.subr.bf16.mxu1 %v2239_v48  ;;  %2230 = vmatpush1.bf16.msra.mxu0 %v2229_v49  ;;  %2429 = vtanh.f32 %v949_v44 }
 0x21e   : > { %v2935_v53 = vpop.eup %2413  ;;  %2242 = vmatpush1.bf16.msra.mxu1 %v2241_v51  ;;  %2431 = vtanh.f32 %v1056_v47  ;;  %v1115_v44 = vpop.permute.xlu0 %1114 }
 0x21f   : > { %v2937_v54 = vpop.eup %2415 }
 0x220   : > { %v2939_v55 = vpop.eup %2417  ;;  %v2233_v63 = vpack.c.bf16 %v2937_v54, %v2929_v50 }
 0x221   : > { %v2941_v56 = vpop.eup %2419 }
 0x222   : > { %v2943_v57 = vpop.eup %2421  ;;  %v2231_v59 = vpack.c.bf16 %v2941_v56, %v2933_v52 }
 0x223   : > { %v2947_v60 = vpop.eup %2423  ;;  %v2243_v61 = vpack.c.bf16 %v2943_v57, %v2935_v53 }
 0x224   : > { %2232 = vmatprep.subr.bf16.mxu0 %v2231_v59  ;;  %v2245_v0 = vpack.c.bf16 %v2939_v55, %v2947_v60 }
 0x225   : > { %v2955_v3 = vpop.eup %2425  ;;  %2244 = vmatprep.subr.bf16.mxu1 %v2243_v61  ;;  %2234 = vmatpush1.bf16.msra.mxu0 %v2233_v63 }
 0x226   : > { %v2957_v4 = vpop.eup %2427  ;;  %2246 = vmatpush1.bf16.msra.mxu1 %v2245_v0  ;;  %2155 = vmatprep.subr.msk.mxu0 %vm833_vm2, %v2955_v3  ;;  %v1120_v0 = vpop.permute.xlu1 %1119 }
 0x227   : > { %2164 = vmatprep.subr.msk.mxu1 %vm833_vm2, %v2957_v4  ;;  %v2966_v7 = vpop.eup %2429 }
 0x228   : > { %v2968_v8 = vpop.eup %2431 }
 0x229   : > { %2156 = vmatpush1.msk.msra.mxu0 %vm833_vm2, %v2966_v7 }
 0x22a   : > { %2165 = vmatpush1.msk.msra.mxu1 %vm833_vm2, %v2968_v8  ;;  %2157 = vmatmul.mubr.msk.f32.vlgmr.msra.gmra.mrb[28].mxu0 %vm811_vm3, %v1088_v6 }
 0x22b   : > { %2166 = vmatmul.mubr.msk.f32.vlgmr.msra.gmra.mrb[28].mxu1 %vm811_vm3, %v1088_v6  ;;  %1240 = vmatprep.mubr.f32.mxu0 %v2589_v1 }
 0x22c   : > { %1347 = vmatprep.mubr.f32.mxu1 %v2589_v1 }
 0x22e   : > { %2158 = vmatmul.mubr.msk.f32.gmra.mrb[30].mxu0 %vm811_vm3, %v1089_v10 }
 0x22f   : > { %2167 = vmatmul.mubr.msk.f32.gmra.mrb[30].mxu1 %vm811_vm3, %v1089_v10  ;;  %1246 = vmatprep.mubr.f32.mxu0 %v2589_v1 }
 0x230   : > { %1353 = vmatprep.mubr.f32.mxu1 %v2589_v1 }
 0x232   : > { %2159 = vmatmul.mubr.msk.f32.gmra.mrb[32].mxu0 %vm811_vm3, %v1090_v11 }
 0x233   : > { %2168 = vmatmul.mubr.msk.f32.gmra.mrb[32].mxu1 %vm811_vm3, %v1090_v11  ;;  %1252 = vmatprep.mubr.f32.mxu0 %v2589_v1 }
 0x234   : > { %1359 = vmatprep.mubr.f32.mxu1 %v2589_v1 }
 0x236   : > { %2160 = vmatmul.mubr.msk.f32.gmra.mrb[34].mxu0 %vm811_vm3, %v1091_v13 }
 0x237   : > { %2169 = vmatmul.mubr.msk.f32.gmra.mrb[34].mxu1 %vm811_vm3, %v1091_v13  ;;  %1258 = vmatprep.mubr.f32.mxu0 %v2589_v1 }
 0x238   : > { %1365 = vmatprep.mubr.f32.mxu1 %v2589_v1 }
 0x23a   : > { %2161 = vmatmul.mubr.msk.f32.gmra.mrb[36].mxu0 %vm811_vm3, %v1092_v15 }
 0x23b   : > { %2170 = vmatmul.mubr.msk.f32.gmra.mrb[36].mxu1 %vm811_vm3, %v1092_v15  ;;  %1264 = vmatprep.mubr.f32.mxu0 %v2589_v1 }
 0x23c   : > { %1371 = vmatprep.mubr.f32.mxu1 %v2589_v1 }
 0x23e   : > { %2162 = vmatmul.mubr.msk.f32.gmra.mrb[38].mxu0 %vm811_vm3, %v1093_v16 }
 0x23f   : > { %2171 = vmatmul.mubr.msk.f32.gmra.mrb[38].mxu1 %vm811_vm3, %v1093_v16  ;;  %1270 = vmatprep.mubr.f32.mxu0 %v2589_v1 }
 0x240   : > { %1377 = vmatprep.mubr.f32.mxu1 %v2589_v1 }
 0x242   : > { %2163 = vmatmul.mubr.msk.f32.gmra.mrb[40].mxu0 %vm811_vm3, %v1094_v17 }
 0x243   : > { %2172 = vmatmul.mubr.msk.f32.gmra.mrb[40].mxu1 %vm811_vm3, %v1094_v17  ;;  %1558 = vmatprep.mubr.f32.mxu0 %v2589_v1 }
 0x244   : > { %1665 = vmatprep.mubr.f32.mxu1 %v2589_v1 }
 0x2fd   : > { %v1236_v20 = vpop.f32.mrb[28].mxu0 }
 0x2fe   : > { %v1237_v21 = vadd.f32 %v1236_v20, %v1105_v19  ;;  %v1343_v22 = vpop.f32.mrb[28].mxu1  ;;  %v1238_v23 = vpop.f32.mrb[29].mxu0 }
 0x2ff   : > { %v1344_v25 = vadd.f32 %v1343_v22, %v1105_v19  ;;  %v1239_v26 = vadd.f32 %v1238_v23, %v1105_v19  ;;  %v1345_v27 = vpop.f32.mrb[29].mxu1 }
 0x300   : > { %2433 = vtanh.f32 %v1237_v21  ;;  %v1346_v28 = vadd.f32 %v1345_v27, %v1105_v19 }
 0x301   : > { %2435 = vtanh.f32 %v1344_v25  ;;  %v1242_v31 = vpop.f32.mrb[30].mxu0  ;;  %v1125_v25 = vpop.permute.xlu0 %1124 }
 0x302   : > { %2437 = vtanh.f32 %v1239_v26  ;;  %v1243_v33 = vadd.f32 %v1242_v31, %v1110_v30  ;;  %v1349_v34 = vpop.f32.mrb[30].mxu1  ;;  %v1244_v36 = vpop.f32.mrb[31].mxu0 }
 0x303   : > { %2439 = vtanh.f32 %v1346_v28  ;;  %v1350_v37 = vadd.f32 %v1349_v34, %v1110_v30  ;;  %v1245_v39 = vadd.f32 %v1244_v36, %v1110_v30  ;;  %v1351_v40 = vpop.f32.mrb[31].mxu1 }
 0x304   : > { %2441 = vtanh.f32 %v1243_v33  ;;  %v1352_v42 = vadd.f32 %v1351_v40, %v1110_v30 }
 0x305   : > { %2443 = vtanh.f32 %v1350_v37  ;;  %v1248_v45 = vpop.f32.mrb[32].mxu0 }
 0x306   : > { %2445 = vtanh.f32 %v1245_v39  ;;  %v1249_v47 = vadd.f32 %v1248_v45, %v1115_v44  ;;  %v1355_v48 = vpop.f32.mrb[32].mxu1  ;;  %v1250_v49 = vpop.f32.mrb[33].mxu0 }
 0x307   : > { %2447 = vtanh.f32 %v1352_v42  ;;  %v1356_v51 = vadd.f32 %v1355_v48, %v1115_v44  ;;  %v1251_v59 = vadd.f32 %v1250_v49, %v1115_v44  ;;  %v1357_v61 = vpop.f32.mrb[33].mxu1 }
 0x308   : > { %2449 = vtanh.f32 %v1249_v47  ;;  %v1358_v63 = vadd.f32 %v1357_v61, %v1115_v44  ;;  %v1130_v47 = vpop.permute.xlu1 %1129 }
 0x309   : > { %2451 = vtanh.f32 %v1356_v51  ;;  %v1254_v6 = vpop.f32.mrb[34].mxu0 }
 0x30a   : > { %v2434_v10 = vpop.eup %2433  ;;  %2453 = vtanh.f32 %v1251_v59  ;;  %v1255_v11 = vadd.f32 %v1254_v6, %v1120_v0  ;;  %v1361_v13 = vpop.f32.mrb[34].mxu1 }
 0x30b   : > { %v1256_v15 = vpop.f32.mrb[35].mxu0  ;;  %v2436_v16 = vpop.eup %2435  ;;  %2455 = vtanh.f32 %v1358_v63  ;;  %v1362_v17 = vadd.f32 %v1361_v13, %v1120_v0 }
 0x30c   : > { %v1257_v19 = vadd.f32 %v1256_v15, %v1120_v0  ;;  %v1363_v20 = vpop.f32.mrb[35].mxu1  ;;  %v2438_v21 = vpop.eup %2437  ;;  %2457 = vtanh.f32 %v1255_v11 }
 0x30d   : > { %v1364_v22 = vadd.f32 %v1363_v20, %v1120_v0  ;;  %v2440_v23 = vpop.eup %2439  ;;  %2459 = vtanh.f32 %v1362_v17  ;;  %v1260_v26 = vpop.f32.mrb[36].mxu0 }
 0x30e   : > { %v2442_v27 = vpop.eup %2441  ;;  %2461 = vtanh.f32 %v1257_v19  ;;  %v1261_v28 = vadd.f32 %v1260_v26, %v1125_v25  ;;  %v1367_v30 = vpop.f32.mrb[36].mxu1 }
 0x30f   : > { %v1262_v31 = vpop.f32.mrb[37].mxu0  ;;  %v2444_v33 = vpop.eup %2443  ;;  %2463 = vtanh.f32 %v1364_v22  ;;  %v1368_v34 = vadd.f32 %v1367_v30, %v1125_v25  ;;  %v2249_v39 = vpack.c.bf16 %v2442_v27, %v2434_v10 }
 0x310   : > { %v1263_v36 = vadd.f32 %v1262_v31, %v1125_v25  ;;  %v1369_v37 = vpop.f32.mrb[37].mxu1  ;;  %v2446_v40 = vpop.eup %2445  ;;  %2465 = vtanh.f32 %v1261_v28  ;;  %v2261_v44 = vpack.c.bf16 %v2444_v33, %v2436_v16 }
 0x311   : > { %v1370_v42 = vadd.f32 %v1369_v37, %v1125_v25  ;;  %v2448_v45 = vpop.eup %2447  ;;  %2467 = vtanh.f32 %v1368_v34  ;;  %v1266_v48 = vpop.f32.mrb[38].mxu0  ;;  %v2247_v49 = vpack.c.bf16 %v2446_v40, %v2438_v21 }
 0x312   : > { %v2450_v51 = vpop.eup %2449  ;;  %2469 = vtanh.f32 %v1263_v36  ;;  %v1267_v59 = vadd.f32 %v1266_v48, %v1130_v47  ;;  %v1373_v61 = vpop.f32.mrb[38].mxu1  ;;  %v2259_v0 = vpack.c.bf16 %v2448_v45, %v2440_v23 }
 0x313   : > { %v1268_v63 = vpop.f32.mrb[39].mxu0  ;;  %v2452_v6 = vpop.eup %2451  ;;  %2471 = vtanh.f32 %v1370_v42  ;;  %v1374_v11 = vadd.f32 %v1373_v61, %v1130_v47  ;;  %2248 = vmatprep.subr.bf16.mxu0 %v2247_v49 }
 0x314   : > { %v1269_v13 = vadd.f32 %v1268_v63, %v1130_v47  ;;  %v1375_v10 = vpop.f32.mrb[39].mxu1  ;;  %v2454_v15 = vpop.eup %2453  ;;  %2473 = vtanh.f32 %v1267_v59  ;;  %2260 = vmatprep.subr.bf16.mxu1 %v2259_v0  ;;  %2250 = vmatpush1.bf16.msra.mxu0 %v2249_v39 }
 0x315   : > { %v1376_v16 = vadd.f32 %v1375_v10, %v1130_v47  ;;  %v2456_v17 = vpop.eup %2455  ;;  %v1135_v19 = vpop.permute.xlu0 %1134  ;;  %2475 = vtanh.f32 %v1374_v11  ;;  %2262 = vmatpush1.bf16.msra.mxu1 %v2261_v44  ;;  %v1412_v10 = vld [vmem:[%s3153_s8] sm:$0xff] }
 0x316   : > { %v1272_v20 = vpop.f32.mrb[40].mxu0  ;;  %v2458_v21 = vpop.eup %2457  ;;  %2477 = vtanh.f32 %v1269_v13 }
 0x317   : > { %v1379_v22 = vpop.f32.mrb[40].mxu1  ;;  %v1274_v23 = vpop.f32.mrb[41].mxu0  ;;  %2479 = vtanh.f32 %v1376_v16  ;;  %v2253_v28 = vpack.c.bf16 %v2458_v21, %v2450_v51  ;;  %v1273_v36 = vadd.f32 %v1272_v20, %v1135_v19  ;;  %v1415_v20 = vld [vmem:[%s3153_s8 + $0x18] sm:$0xff]  ;;  %v1416_v21 = vld [vmem:[%s3153_s8 + $0x20] sm:$0xff] }
 0x318   : > { %v2460_v25 = vpop.eup %2459  ;;  %v1275_v26 = vadd.f32 %v1274_v23, %v1135_v19  ;;  %v1381_v27 = vpop.f32.mrb[41].mxu1  ;;  %v1380_v40 = vadd.f32 %v1379_v22, %v1135_v19  ;;  %v1417_v22 = vld [vmem:[%s3153_s8 + $0x28] sm:$0xff]  ;;  %v1418_v23 = vld [vmem:[%s3153_s8 + $0x30] sm:$0x3] }
 0x319   : > { %v2462_v30 = vpop.eup %2461  ;;  %v1382_v31 = vadd.f32 %v1381_v27, %v1135_v19  ;;  %v2265_v33 = vpack.c.bf16 %v2460_v25, %v2452_v6  ;;  %v1414_v19 = vld [vmem:[%s3153_s8 + $0x10] sm:$0xff]  ;;  %v1429_v25 = vpop.permute.xlu1 %1428 }
 0x31a   : > { %v2464_v34 = vpop.eup %2463  ;;  %v2251_v37 = vpack.c.bf16 %v2462_v30, %v2454_v15  ;;  %2481 = vtanh.f32 %v1275_v26 }
 0x31b   : > { %v2466_v39 = vpop.eup %2465  ;;  %v2263_v42 = vpack.c.bf16 %v2464_v34, %v2456_v17  ;;  %2483 = vtanh.f32 %v1382_v31  ;;  %v1413_v17 = vld [vmem:[%s3153_s8 + $0x8] sm:$0xff] }
 0x31c   : > { %v2468_v44 = vpop.eup %2467  ;;  %2252 = vmatprep.subr.bf16.mxu0 %v2251_v37  ;;  %2485 = vtanh.f32 %v1273_v36 }
 0x31d   : > { %v2470_v45 = vpop.eup %2469  ;;  %2264 = vmatprep.subr.bf16.mxu1 %v2263_v42  ;;  %2254 = vmatpush1.bf16.msra.mxu0 %v2253_v28  ;;  %2487 = vtanh.f32 %v1380_v40 }
 0x31e   : > { %v2472_v47 = vpop.eup %2471  ;;  %2266 = vmatpush1.bf16.msra.mxu1 %v2265_v33 }
 0x31f   : > { %v2474_v48 = vpop.eup %2473 }
 0x320   : > { %v2476_v49 = vpop.eup %2475  ;;  %v2257_v51 = vpack.c.bf16 %v2474_v48, %v2466_v39  ;;  %v1434_v39 = vpop.permute.xlu0 %1433 }
 0x321   : > { %v2478_v59 = vpop.eup %2477  ;;  %v2269_v61 = vpack.c.bf16 %v2476_v49, %v2468_v44 }
 0x322   : > { %v2480_v63 = vpop.eup %2479  ;;  %v2255_v0 = vpack.c.bf16 %v2478_v59, %v2470_v45 }
 0x323   : > { %v2267_v6 = vpack.c.bf16 %v2480_v63, %v2472_v47  ;;  %v1439_v63 = vpop.permute.xlu1 %1438 }
 0x324   : > { %2256 = vmatprep.subr.bf16.mxu0 %v2255_v0  ;;  %v2482_v11 = vpop.eup %2481 }
 0x325   : > { %2268 = vmatprep.subr.bf16.mxu1 %v2267_v6  ;;  %2258 = vmatpush1.bf16.msra.mxu0 %v2257_v51  ;;  %v2484_v13 = vpop.eup %2483 }
 0x326   : > { %2270 = vmatpush1.bf16.msra.mxu1 %v2269_v61  ;;  %2173 = vmatprep.subr.msk.mxu0 %vm833_vm2, %v2482_v11  ;;  %v2486_v15 = vpop.eup %2485 }
 0x327   : > { %2182 = vmatprep.subr.msk.mxu1 %vm833_vm2, %v2484_v13  ;;  %v2488_v16 = vpop.eup %2487 }
 0x329   : > { %2174 = vmatpush1.msk.msra.mxu0 %vm833_vm2, %v2486_v15 }
 0x32a   : > { %2183 = vmatpush1.msk.msra.mxu1 %vm833_vm2, %v2488_v16  ;;  %2175 = vmatmul.mubr.msk.f32.vlgmr.msra.gmra.mrb[42].mxu0 %vm811_vm3, %v1412_v10 }
 0x32b   : > { %2184 = vmatmul.mubr.msk.f32.vlgmr.msra.gmra.mrb[42].mxu1 %vm811_vm3, %v1412_v10  ;;  %1564 = vmatprep.mubr.f32.mxu0 %v2589_v1 }
 0x32c   : > { %1671 = vmatprep.mubr.f32.mxu1 %v2589_v1 }
 0x32e   : > { %2176 = vmatmul.mubr.msk.f32.gmra.mrb[44].mxu0 %vm811_vm3, %v1413_v17 }
 0x32f   : > { %2185 = vmatmul.mubr.msk.f32.gmra.mrb[44].mxu1 %vm811_vm3, %v1413_v17  ;;  %1570 = vmatprep.mubr.f32.mxu0 %v2589_v1 }
 0x330   : > { %1677 = vmatprep.mubr.f32.mxu1 %v2589_v1 }
 0x332   : > { %2177 = vmatmul.mubr.msk.f32.gmra.mrb[46].mxu0 %vm811_vm3, %v1414_v19 }
 0x333   : > { %2186 = vmatmul.mubr.msk.f32.gmra.mrb[46].mxu1 %vm811_vm3, %v1414_v19  ;;  %1576 = vmatprep.mubr.f32.mxu0 %v2589_v1  ;;  %v1444_v19 = vpop.permute.xlu0 %1443 }
 0x334   : > { %1683 = vmatprep.mubr.f32.mxu1 %v2589_v1 }
 0x336   : > { %2178 = vmatmul.mubr.msk.f32.gmra.mrb[48].mxu0 %vm811_vm3, %v1415_v20 }
 0x337   : > { %2187 = vmatmul.mubr.msk.f32.gmra.mrb[48].mxu1 %vm811_vm3, %v1415_v20  ;;  %1582 = vmatprep.mubr.f32.mxu0 %v2589_v1 }
 0x338   : > { %1689 = vmatprep.mubr.f32.mxu1 %v2589_v1 }
 0x33a   : > { %2179 = vmatmul.mubr.msk.f32.gmra.mrb[50].mxu0 %vm811_vm3, %v1416_v21 }
 0x33b   : > { %2188 = vmatmul.mubr.msk.f32.gmra.mrb[50].mxu1 %vm811_vm3, %v1416_v21  ;;  %1588 = vmatprep.mubr.f32.mxu0 %v2589_v1 }
 0x33c   : > { %1695 = vmatprep.mubr.f32.mxu1 %v2589_v1 }
 0x33e   : > { %2180 = vmatmul.mubr.msk.f32.gmra.mrb[52].mxu0 %vm811_vm3, %v1417_v22 }
 0x33f   : > { %2189 = vmatmul.mubr.msk.f32.gmra.mrb[52].mxu1 %vm811_vm3, %v1417_v22  ;;  %1594 = vmatprep.mubr.f32.mxu0 %v2589_v1 }
 0x340   : > { %1701 = vmatprep.mubr.f32.mxu1 %v2589_v1 }
 0x342   : > { %2181 = vmatmul.mubr.msk.f32.gmra.mrb[54].mxu0 %vm811_vm3, %v1418_v23 }
 0x343   : > { %2190 = vmatmul.mubr.msk.f32.gmra.mrb[54].mxu1 %vm811_vm3, %v1418_v23  ;;  %1854 = vmatprep.mubr.f32.mxu0 %v2589_v1 }
 0x344   : > { %1925 = vmatprep.mubr.f32.mxu1 %v2589_v1 }
 0x3fd   : > { %v1560_v26 = vpop.f32.mrb[42].mxu0 }
 0x3fe   : > { %v1561_v27 = vadd.f32 %v1560_v26, %v1429_v25  ;;  %v1667_v28 = vpop.f32.mrb[42].mxu1  ;;  %v1562_v30 = vpop.f32.mrb[43].mxu0 }
 0x3ff   : > { %v1668_v31 = vadd.f32 %v1667_v28, %v1429_v25  ;;  %v1563_v33 = vadd.f32 %v1562_v30, %v1429_v25  ;;  %v1669_v34 = vpop.f32.mrb[43].mxu1 }
 0x400   : > { %v1708_v36 = vadd.f32 %v2883_v58, %v1561_v27  ;;  %v1670_v37 = vadd.f32 %v1669_v34, %v1429_v25 }
 0x401   : > { %v1710_v40 = vadd.f32 %v2899_v18, %v1668_v31  ;;  %v1709_v42 = vadd.f32 %v2885_v62, %v1563_v33  ;;  %v1566_v44 = vpop.f32.mrb[44].mxu0 }
 0x402   : > { %2489 = vtanh.f32 %v1708_v36  ;;  %v1711_v1 = vadd.f32 %v2887_v2, %v1670_v37  ;;  %v1567_v45 = vadd.f32 %v1566_v44, %v1434_v39  ;;  %v1673_v47 = vpop.f32.mrb[44].mxu1  ;;  %v1568_v48 = vpop.f32.mrb[45].mxu0 }
 0x403   : > { %2491 = vtanh.f32 %v1710_v40  ;;  %v1674_v49 = vadd.f32 %v1673_v47, %v1434_v39  ;;  %v1569_v51 = vadd.f32 %v1568_v48, %v1434_v39  ;;  %v1675_v59 = vpop.f32.mrb[45].mxu1 }
 0x404   : > { %2493 = vtanh.f32 %v1709_v42  ;;  %v1712_v58 = vadd.f32 %v2889_v5, %v1567_v45  ;;  %v1676_v61 = vadd.f32 %v1675_v59, %v1434_v39 }
 0x405   : > { %2495 = vtanh.f32 %v1711_v1  ;;  %v1714_v18 = vadd.f32 %v2891_v9, %v1674_v49  ;;  %v1713_v62 = vadd.f32 %v2893_v12, %v1569_v51  ;;  %v1572_v0 = vpop.f32.mrb[46].mxu0 }
 0x406   : > { %2497 = vtanh.f32 %v1712_v58  ;;  %v1715_v2 = vadd.f32 %v2895_v14, %v1676_v61  ;;  %v1573_v6 = vadd.f32 %v1572_v0, %v1439_v63  ;;  %v1679_v11 = vpop.f32.mrb[46].mxu1  ;;  %v1574_v13 = vpop.f32.mrb[47].mxu0 }
 0x407   : > { %2499 = vtanh.f32 %v1714_v18  ;;  %v1680_v10 = vadd.f32 %v1679_v11, %v1439_v63  ;;  %v1575_v15 = vadd.f32 %v1574_v13, %v1439_v63  ;;  %v1681_v16 = vpop.f32.mrb[47].mxu1 }
 0x408   : > { %2501 = vtanh.f32 %v1713_v62  ;;  %v1716_v5 = vadd.f32 %v2905_v24, %v1573_v6  ;;  %v1682_v17 = vadd.f32 %v1681_v16, %v1439_v63 }
 0x409   : > { %2503 = vtanh.f32 %v1715_v2  ;;  %v1718_v9 = vadd.f32 %v2923_v46, %v1680_v10  ;;  %v1717_v12 = vadd.f32 %v2909_v29, %v1575_v15  ;;  %v1578_v20 = vpop.f32.mrb[48].mxu0  ;;  %v1449_v46 = vpop.permute.xlu1 %1448 }
 0x40a   : > { %2505 = vtanh.f32 %v1716_v5  ;;  %v1719_v14 = vadd.f32 %v2911_v32, %v1682_v17  ;;  %v1579_v21 = vadd.f32 %v1578_v20, %v1444_v19  ;;  %v1685_v22 = vpop.f32.mrb[48].mxu1  ;;  %v1580_v23 = vpop.f32.mrb[49].mxu0 }
 0x40b   : > { %2507 = vtanh.f32 %v1718_v9  ;;  %v1686_v25 = vadd.f32 %v1685_v22, %v1444_v19  ;;  %v1581_v26 = vadd.f32 %v1580_v23, %v1444_v19  ;;  %v1687_v27 = vpop.f32.mrb[49].mxu1 }
 0x40c   : > { %v2490_v28 = vpop.eup %2489  ;;  %2509 = vtanh.f32 %v1717_v12  ;;  %v1720_v24 = vadd.f32 %v2913_v35, %v1579_v21  ;;  %v1688_v30 = vadd.f32 %v1687_v27, %v1444_v19 }
 0x40d   : > { %v3086_v31 = vpop.eup %2491  ;;  %2511 = vtanh.f32 %v1719_v14  ;;  %v1722_v29 = vadd.f32 %v2915_v38, %v1686_v25  ;;  %v1721_v32 = vadd.f32 %v2917_v41, %v1581_v26  ;;  %v1584_v33 = vpop.f32.mrb[50].mxu0 }
 0x40e   : > { %v2494_v34 = vpop.eup %2493  ;;  %2513 = vtanh.f32 %v1720_v24  ;;  %v1723_v36 = vadd.f32 %v2919_v43, %v1688_v30  ;;  %v1585_v37 = vadd.f32 %v1584_v33, %v1449_v46  ;;  %v1691_v39 = vpop.f32.mrb[50].mxu1 }
 0x40f   : > { %v1586_v40 = vpop.f32.mrb[51].mxu0  ;;  %v2496_v42 = vpop.eup %2495  ;;  %2515 = vtanh.f32 %v1722_v29  ;;  %v1692_v35 = vadd.f32 %v1691_v39, %v1449_v46 }
 0x410   : > { %v1587_v44 = vadd.f32 %v1586_v40, %v1449_v46  ;;  %v1693_v1 = vpop.f32.mrb[51].mxu1  ;;  %v2498_v45 = vpop.eup %2497  ;;  %2517 = vtanh.f32 %v1721_v32  ;;  %v1724_v47 = vadd.f32 %v2929_v50, %v1585_v37 }
 0x411   : > { %v1694_v38 = vadd.f32 %v1693_v1, %v1449_v46  ;;  %v2500_v48 = vpop.eup %2499  ;;  %v1454_v41 = vpop.permute.xlu0 %1453  ;;  %2519 = vtanh.f32 %v1723_v36  ;;  %v1726_v49 = vadd.f32 %v2947_v60, %v1692_v35  ;;  %v2273_v59 = vpack.c.bf16 %v2498_v45, %v2490_v28 }
 0x412   : > { %v1725_v43 = vadd.f32 %v2933_v52, %v1587_v44  ;;  %v1590_v51 = vpop.f32.mrb[52].mxu0  ;;  %v2502_v58 = vpop.eup %2501  ;;  %2521 = vtanh.f32 %v1724_v47  ;;  %v2285_v0 = vpack.c.bf16 %v2500_v48, %v3086_v31  ;;  %v1764_v47 = vld [vmem:[%s3155_s10] sm:$0x1] }
 0x413   : > { %v1727_v61 = vadd.f32 %v2935_v53, %v1694_v38  ;;  %v1591_v63 = vadd.f32 %v1590_v51, %v1454_v41  ;;  %v1697_v18 = vpop.f32.mrb[52].mxu1  ;;  %v1592_v62 = vpop.f32.mrb[53].mxu0  ;;  %2523 = vtanh.f32 %v1726_v49  ;;  %v2271_v13 = vpack.c.bf16 %v2502_v58, %v2494_v34 }
 0x414   : > { %v2504_v50 = vpop.eup %2503  ;;  %v1698_v2 = vadd.f32 %v1697_v18, %v1454_v41  ;;  %v1593_v6 = vadd.f32 %v1592_v62, %v1454_v41  ;;  %v1699_v11 = vpop.f32.mrb[53].mxu1  ;;  %2525 = vtanh.f32 %v1725_v43 }
 0x415   : > { %v2506_v60 = vpop.eup %2505  ;;  %v1728_v52 = vadd.f32 %v2937_v54, %v1591_v63  ;;  %v1700_v10 = vadd.f32 %v1699_v11, %v1454_v41  ;;  %v2283_v15 = vpack.c.bf16 %v2504_v50, %v2496_v42  ;;  %v1459_v5 = vpop.permute.xlu1 %1458  ;;  %2527 = vtanh.f32 %v1727_v61  ;;  %2272 = vmatprep.subr.bf16.mxu0 %v2271_v13 }
 0x416   : > { %v2508_v16 = vpop.eup %2507  ;;  %v1730_v53 = vadd.f32 %v2939_v55, %v1698_v2  ;;  %v1729_v17 = vadd.f32 %v2941_v56, %v1593_v6  ;;  %v1596_v19 = vpop.f32.mrb[54].mxu0  ;;  %2274 = vmatpush1.bf16.msra.mxu0 %v2273_v59  ;;  %v1771_v41 = vlaneseq }
 0x417   : > { %v2510_v9 = vpop.eup %2509  ;;  %2529 = vtanh.f32 %v1728_v52  ;;  %v1731_v12 = vadd.f32 %v2943_v57, %v1700_v10  ;;  %2284 = vmatprep.subr.bf16.mxu1 %v2283_v15  ;;  %v1703_v20 = vpop.f32.mrb[54].mxu1  ;;  %v1597_v21 = vadd.f32 %v1596_v19, %v1459_v5 }
 0x418   : > { %v1598_v14 = vpop.f32.mrb[55].mxu0  ;;  %v2512_v54 = vpop.eup %2511  ;;  %2531 = vtanh.f32 %v1730_v53  ;;  %2286 = vmatpush1.bf16.msra.mxu1 %v2285_v0  ;;  %v1704_v55 = vadd.f32 %v1703_v20, %v1459_v5  ;;  %v3114_v49 = vshrl.u32 %v1771_v41, 7  ;;  %vm2042_vm8 = vcmp.lt.s32.totalorder %v1771_v41, 512 }
 0x419   : > { %v1599_v22 = vadd.f32 %v1598_v14, %v1459_v5  ;;  %v1705_v23 = vpop.f32.mrb[55].mxu1  ;;  %v2514_v25 = vpop.eup %2513  ;;  %2533 = vtanh.f32 %v1729_v17  ;;  %v1732_v46 = vadd.f32 %v2966_v7, %v1597_v21 }
 0x41a   : > { %v1706_v56 = vadd.f32 %v1705_v23, %v1459_v5  ;;  %v2516_v26 = vpop.eup %2515  ;;  %2535 = vtanh.f32 %v1731_v12  ;;  %v2277_v28 = vpack.c.bf16 %v2514_v25, %v2506_v60  ;;  %v1734_v33 = vadd.f32 %v2968_v8, %v1704_v55  ;;  %v1769_v51 = vpop.permute.xlu0 %1768 }
 0x41b   : > { %v1733_v27 = vadd.f32 %v2955_v3, %v1599_v22  ;;  %v2518_v57 = vpop.eup %2517  ;;  %v2289_v30 = vpack.c.bf16 %v2516_v26, %v2508_v16  ;;  %v1773_v43 = vsub.s32 0, %v3114_v49 }
 0x41c   : > { %v1735_v24 = vadd.f32 %v2957_v4, %v1706_v56  ;;  %v2520_v31 = vpop.eup %2519  ;;  %v2275_v29 = vpack.c.bf16 %v2518_v57, %v2510_v9 }
 0x41d   : > { %v2522_v32 = vpop.eup %2521  ;;  %2537 = vtanh.f32 %v1733_v27  ;;  %v2287_v34 = vpack.c.bf16 %v2520_v31, %v2512_v54  ;;  %v1774_v59 = vrot.slane %v1769_v51, %v1773_v43 }
 0x41e   : > { %v2524_v36 = vpop.eup %2523  ;;  %2539 = vtanh.f32 %v1735_v24  ;;  %2276 = vmatprep.subr.bf16.mxu0 %v2275_v29  ;;  %v2591_v24 = vmov 1966171168  }
 0x41f   : > { %v2526_v37 = vpop.eup %2525  ;;  %2288 = vmatprep.subr.bf16.mxu1 %v2287_v34  ;;  %2278 = vmatpush1.bf16.msra.mxu0 %v2277_v28  ;;  %2541 = vtanh.f32 %v1732_v46  ;;  %v1997_v34 = vstv %s2117_s14 }
 0x420   : > { %v2528_v3 = vpop.eup %2527  ;;  %2290 = vmatpush1.bf16.msra.mxu1 %v2289_v30  ;;  %2543 = vtanh.f32 %v1734_v33  ;;  %v2018_v30 = vunpack.c.l.s4 %v2591_v24  ;;  %v1992_v33 = vstv %s431_s30 }
 0x421   : > { %v2530_v4 = vpop.eup %2529 }
 0x422   : > { %v2532_v39 = vpop.eup %2531  ;;  %v2281_v40 = vpack.c.bf16 %v2530_v4, %v2522_v32 }
 0x423   : > { %v2534_v7 = vpop.eup %2533  ;;  %v2293_v42 = vpack.c.bf16 %v2532_v39, %v2524_v36 }
 0x424   : > { %v2536_v35 = vpop.eup %2535  ;;  %v2279_v44 = vpack.c.bf16 %v2534_v7, %v2526_v37 }
 0x425   : > { %v2291_v8 = vpack.c.bf16 %v2536_v35, %v2528_v3 }
 0x426   : > { %2280 = vmatprep.subr.bf16.mxu0 %v2279_v44 }
 0x427   : > { %v2538_v1 = vpop.eup %2537  ;;  %2292 = vmatprep.subr.bf16.mxu1 %v2291_v8  ;;  %2282 = vmatpush1.bf16.msra.mxu0 %v2281_v40 }
 0x428   : > { %v2540_v45 = vpop.eup %2539  ;;  %2294 = vmatpush1.bf16.msra.mxu1 %v2293_v42  ;;  %2191 = vmatprep.subr.msk.mxu0 %vm833_vm2, %v2538_v1 }
 0x429   : > { %2194 = vmatprep.subr.msk.mxu1 %vm833_vm2, %v2540_v45  ;;  %v2542_v38 = vpop.eup %2541 }
 0x42a   : > { %v2544_v48 = vpop.eup %2543 }
 0x42b   : > { %2192 = vmatpush1.msk.msra.mxu0 %vm833_vm2, %v2542_v38 }
 0x42c   : > { %2195 = vmatpush1.msk.msra.mxu1 %vm833_vm2, %v2544_v48  ;;  %2193 = vmatmul.mubr.msk.f32.vlgmr.msra.gmra.mrb[56].mxu0 %vm811_vm3, %v1764_v47 }
 0x42d   : > { %2196 = vmatmul.mubr.msk.f32.vlgmr.msra.gmra.mrb[56].mxu1 %vm811_vm3, %v1764_v47 }
 0x4ff   : > { %v1856_v58 = vpop.f32.mrb[56].mxu0 }
 0x500   : > { %v3117_v61 = vadd.f32 %v1856_v58, %v1774_v59  ;;  %v1927_v63 = vpop.f32.mrb[56].mxu1  ;;  %v1858_v18 = vpop.f32.mrb[57].mxu0 }
 0x501   : > { %v3119_v62 = vadd.f32 %v1927_v63, %v1774_v59  ;;  %v3121_v0 = vadd.f32 %v1858_v18, %v1774_v59  ;;  %v1929_v50 = vpop.f32.mrb[57].mxu1 }
 0x502   : > { %v1936_v2 = vand.u32 2147483647, %v3117_v61  ;;  %v3124_v6 = vadd.f32 %v1929_v50, %v1774_v59  ;;  %v1932_v32 = vmax.f32 %v3117_v61, 0.0 }
 0x503   : > { %v1938_v11 = vand.u32 2147483647, %v3119_v62  ;;  %v1937_v13 = vand.u32 2147483647, %v3121_v0  ;;  %v1934_v39 = vmax.f32 %v3119_v62, 0.0  ;;  %v1933_v43 = vmax.f32 %v3121_v0, 0.0 }
 0x504   : > { %v1940_v60 = vsub.f32 0.0, %v1936_v2  ;;  %v1939_v52 = vand.u32 2147483647, %v3124_v6  ;;  %v1935_v62 = vmax.f32 %v3124_v6, 0.0 }
 0x505   : > { %v1942_v10 = vsub.f32 0.0, %v1938_v11  ;;  %v1941_v15 = vsub.f32 0.0, %v1937_v13 }
 0x506   : > { %v1944_v16 = vmul.f32 1.442695, %v1940_v60  ;;  %v1943_v5 = vsub.f32 0.0, %v1939_v52  ;;  %v2006_v52 = vstv %s3130_s15 }
 0x507   : > { %v1948_v53 = vmul.f32 1.442695, %v1942_v10  ;;  %v1946_v17 = vmul.f32 1.442695, %v1941_v15  ;;  %v2019_v15 = vunpack.c.0.s8 %v2018_v30 }
 0x508   : > { %2545 = vpow2.f32 %v1944_v16  ;;  %v1950_v19 = vmul.f32 1.442695, %v1943_v5 }
 0x509   : > { %2547 = vpow2.f32 %v1948_v53 }
 0x50a   : > { %2549 = vpow2.f32 %v1946_v17 }
 0x50b   : > { %2551 = vpow2.f32 %v1950_v19 }
 0x512   : > { %v2546_v9 = vpop.eup %2545 }
 0x513   : > { %v2548_v12 = vpop.eup %2547  ;;  %v1952_v20 = vadd.f32 1.0, %v2546_v9  ;;  %v1955_v25 = vmul.f32 -0.5, %v2546_v9  ;;  %v1958_v28 = vand.u32 2147483647, %v2546_v9 }
 0x514   : > { %v2550_v14 = vpop.eup %2549  ;;  %v1970_v54 = vadd.f32 1.0, %v2548_v12  ;;  %v1973_v55 = vmul.f32 -0.5, %v2548_v12  ;;  %v1976_v31 = vand.u32 2147483647, %v2548_v12 }
 0x515   : > { %v2552_v21 = vpop.eup %2551  ;;  %2553 = vlog2.f32 %v1952_v20  ;;  %v1961_v22 = vadd.f32 1.0, %v2550_v14  ;;  %v1964_v56 = vmul.f32 -0.5, %v2550_v14  ;;  %v1956_v26 = vadd.f32 1.0, %v1955_v25 }
 0x516   : > { %2555 = vlog2.f32 %v1970_v54  ;;  %v1979_v23 = vadd.f32 1.0, %v2552_v21  ;;  %v1982_v27 = vmul.f32 -0.5, %v2552_v21  ;;  %v1974_v57 = vadd.f32 1.0, %v1973_v55 }
 0x517   : > { %2557 = vlog2.f32 %v1961_v22  ;;  %v1965_v46 = vadd.f32 1.0, %v1964_v56  ;;  %v1967_v36 = vand.u32 2147483647, %v2550_v14  ;;  %v1957_v4 = vmul.f32 %v2546_v9, %v1956_v26 }
 0x518   : > { %2559 = vlog2.f32 %v1979_v23  ;;  %v1983_v40 = vadd.f32 1.0, %v1982_v27  ;;  %vm1959_vm4 = vcmp.lt.f32.partialorder %v1958_v28, 0.0004427343  ;;  %v1975_v35 = vmul.f32 %v2548_v12, %v1974_v57 }
 0x519   : > { %v1985_v44 = vand.u32 2147483647, %v2552_v21  ;;  %vm1977_vm5 = vcmp.lt.f32.partialorder %v1976_v31, 0.0004427343  ;;  %v1966_v45 = vmul.f32 %v2550_v14, %v1965_v46  ;;  %vm1968_vm6 = vcmp.lt.f32.partialorder %v1967_v36, 0.0004427343 }
 0x51a   : > { %v1984_v61 = vmul.f32 %v2552_v21, %v1983_v40  ;;  %v2022_v12 = vsub.s32 %v2019_v15, %v3114_v49 }
 0x51b   : > { %vm1986_vm7 = vcmp.lt.f32.partialorder %v1985_v44, 0.0004427343 }
 0x51f   : > { %v2554_v29 = vpop.eup %2553 }
 0x520   : > { %v2556_v37 = vpop.eup %2555  ;;  %v1954_v3 = vmul.f32 0.6931472, %v2554_v29 }
 0x521   : > { %v2558_v7 = vpop.eup %2557  ;;  %v1972_v42 = vmul.f32 0.6931472, %v2556_v37 }
 0x522   : > { %v1960_v8 = vsel %vm1959_vm4, %v1957_v4, %v1954_v3  ;;  %v1963_v1 = vmul.f32 0.6931472, %v2558_v7  ;;  %v2560_v47 = vpop.eup %2559 }
 0x523   : > { %v1988_v38 = vadd.f32 %v1960_v8, %v1932_v32  ;;  %v1978_v48 = vsel %vm1977_vm5, %v1975_v35, %v1972_v42  ;;  %v1981_v58 = vmul.f32 0.6931472, %v2560_v47 }
 0x524   : > { %v1990_v51 = vadd.f32 %v1978_v48, %v1934_v39  ;;  %v1969_v59 = vsel %vm1968_vm6, %v1966_v45, %v1963_v1 }
 0x525   : > { %v1993_v63 = vmul.f32 %v1992_v33, %v1988_v38  ;;  %v1989_v18 = vadd.f32 %v1969_v59, %v1933_v43  ;;  %v1987_v2 = vsel %vm1986_vm7, %v1984_v61, %v1981_v58 }
 0x526   : > { %v1995_v50 = vmul.f32 %v1992_v33, %v1990_v51  ;;  %v1991_v60 = vadd.f32 %v1987_v2, %v1935_v62 }
 0x527   : > { %v1998_v11 = vadd.f32 %v1997_v34, %v1993_v63  ;;  %v1994_v13 = vmul.f32 %v1992_v33, %v1989_v18 }
 0x528   : > { %v2000_v10 = vadd.f32 %v1997_v34, %v1995_v50  ;;  %v1996_v5 = vmul.f32 %v1992_v33, %v1991_v60 }
 0x529   : > { %v2002_v16 = vmax.f32 %v1997_v34, %v1998_v11  ;;  %v1999_v0 = vadd.f32 %v1997_v34, %v1994_v13 }
 0x52a   : > { %v2004_v53 = vmax.f32 %v1997_v34, %v2000_v10  ;;  %v2001_v9 = vadd.f32 %v1997_v34, %v1996_v5 }
 0x52b   : > { %v2007_v17 = vmin.f32 %v2006_v52, %v2002_v16  ;;  %v2003_v19 = vmax.f32 %v1997_v34, %v1999_v0 }
 0x52c   : > { %v2009_v6 = vmin.f32 %v2006_v52, %v2004_v53  ;;  %v2005_v14 = vmax.f32 %v1997_v34, %v2001_v9 }
 0x52d   : > { %v2008_v20 = vmin.f32 %v2006_v52, %v2003_v19 }
 0x52e   : > { %v2010_v21 = vmin.f32 %v2006_v52, %v2005_v14 }
 0x52f   : > { %v2015_v54 = vcombine.low %v2007_v17, %v2008_v20 }
 0x530   : > { %v2016_v23 = vcombine.low %v2009_v6, %v2010_v21 }
 0x531   : > { %v2023_v22 = vrot.slane %v2015_v54, %v2022_v12 }
 0x532   : > { %v2030_v25 = vrot.slane %v2016_v23, %v2022_v12 }
 0x534   : > { %v2031_v55 = vcombine.low %v2023_v22, %v2030_v25 }
 0x536   : > { %v2038_v56 = vrot.slane %v2031_v55, %v2022_v12 }
 0x538   : > { %2044 = vst.msk [vmem:[%s429_s18] sm:$0xf] %vm2042_vm8, %v2038_v56 }
 0x539 PF: > { %s25_s23 = sadd.s32 1, %s2586_s23  }
 0x53a   : > { %p22_p1 = scmp.ge.s32.totalorder %s25_s23, 4  }
 0x53c   :  { %24 = sbr.rel (!%p22_p1) target bundleno = 4 (0x4), region = 103 }
 0x543   :  { %2065 = vsyncpa [#allocation4], 1 }
 0x544   :  { %2067 = vsyncpa [#allocation4 + $0x1], 1 }

</bundles_post_ra>
